<compile_context>
chip_gen: v7x
topology: tpu7x:2x2x1
jax: 0.10.0
libtpu: 0.0.40
codegen_flags: <defaults>
</compile_context>

<pallas_src>
import functools
import math

import jax
import jax.numpy as jnp
from jax import lax
from jax.experimental import pallas as pl
from jax.experimental.pallas import tpu as pltpu


_RMS_EPS = 1.1920929e-07  # torch nn.RMSNorm default eps = finfo(f32).eps

# Static conv hyper-params (stride, pad) for the three embed convs:
# Conv1d(in,d,7,2,3), Conv1d(d,d,5,2,2), Conv1d(d,d,3,2,1)
CONV_STRIDE_PAD = ((2, 3), (2, 2), (2, 1))


def _round_up(v, m):
    return (v + m - 1) // m * m


# ------------------- tiled matmul + bias (conv-as-matmul) -------------------

def _matmul_bias_kernel(x_ref, w_ref, b_ref, o_ref, acc_ref, *, activation):
    @pl.when(pl.program_id(2) == 0)
    def _():
        acc_ref[...] = jnp.zeros_like(acc_ref)

    acc_ref[...] += jnp.dot(
        x_ref[...].astype(jnp.bfloat16),
        w_ref[...].astype(jnp.bfloat16),
        preferred_element_type=jnp.float32)

    @pl.when(pl.program_id(2) == pl.num_programs(2) - 1)
    def _():
        acc = acc_ref[...] + b_ref[...]
        if activation == "relu":
            acc = jnp.maximum(acc, 0.0)
        o_ref[...] = acc.astype(o_ref.dtype)


def matmul_bias(x, w, b, activation="none"):
    """x: (M, K) @ w: (K, N) + b: (N,), tiled & pipelined; bf16 MXU, f32 acc."""
    M, K = x.shape
    K2, N = w.shape
    assert K == K2
    # Tile choice: modest tiles that double-buffer comfortably in 64 MiB VMEM
    # (v7x) and collapse to full blocks at small shapes.
    tm = min(256, _round_up(M, 8))
    tn = min(256, _round_up(N, 128))
    tk = min(512, _round_up(K, 128))
    Mp, Kp, Np = _round_up(M, tm), _round_up(K, tk), _round_up(N, tn)
    xp = jnp.pad(x, ((0, Mp - M), (0, Kp - K))) if (Mp, Kp) != (M, K) else x
    wp = jnp.pad(w, ((0, Kp - K), (0, Np - N))) if (Kp, Np) != (K, N) else w
    bp = jnp.pad(b, (0, Np - N)) if Np != N else b
    out = pl.pallas_call(
        functools.partial(_matmul_bias_kernel, activation=activation),
        out_shape=jax.ShapeDtypeStruct((Mp, Np), x.dtype),
        grid=(Mp // tm, Np // tn, Kp // tk),
        in_specs=[
            pl.BlockSpec((tm, tk), lambda i, j, k: (i, k)),
            pl.BlockSpec((tk, tn), lambda i, j, k: (k, j)),
            pl.BlockSpec((1, tn), lambda i, j, k: (0, j)),
        ],
        out_specs=pl.BlockSpec((tm, tn), lambda i, j, k: (i, j)),
        scratch_shapes=[pltpu.VMEM((tm, tn), jnp.float32)],
        compiler_params=pltpu.CompilerParams(
            dimension_semantics=("parallel", "parallel", "arbitrary")),
    )(xp, wp, bp.reshape(1, Np))
    return out[:M, :N]


# ---------------- BatchNorm(train, batch stats) + ReLU kernel ----------------

def _scale_shift_relu_kernel(x_ref, s_ref, b_ref, o_ref):
    o_ref[...] = jnp.maximum(
        x_ref[...] * s_ref[...] + b_ref[...], 0.0).astype(o_ref.dtype)


def batchnorm_relu(y, gamma, beta, eps=1e-5):
    """Training-mode BatchNorm1d (batch stats over (B, L)) + ReLU; y is (B,L,C)."""
    B, L, C = y.shape
    M = B * L
    y2 = y.reshape(M, C)
    mean = jnp.mean(y2, axis=0)
    var = jnp.mean(jnp.square(y2 - mean), axis=0)   # biased var (torch train-mode)
    scale = gamma * lax.rsqrt(var + eps)
    shift = beta - mean * scale
    # Pack several rows per vreg row so the last dim is a multiple of 128 lanes
    # (unmasked vld/vst instead of vst.msk with C=32).
    pack = 1
    if C < 128:
        pack = max(1, 128 // C)
        while pack > 1 and M % pack != 0:
            pack //= 2
    Mr, Cr = M // pack, C * pack
    x2 = y2.reshape(Mr, Cr)
    s2 = jnp.tile(scale, pack).reshape(1, Cr)
    b2 = jnp.tile(shift, pack).reshape(1, Cr)
    tm = min(512, _round_up(Mr, 8))
    Mp = _round_up(Mr, tm)
    if Mp != Mr:
        x2 = jnp.pad(x2, ((0, Mp - Mr), (0, 0)))
    out = pl.pallas_call(
        _scale_shift_relu_kernel,
        out_shape=jax.ShapeDtypeStruct((Mp, Cr), y.dtype),
        grid=(Mp // tm,),
        in_specs=[
            pl.BlockSpec((tm, Cr), lambda i: (i, 0)),
            pl.BlockSpec((1, Cr), lambda i: (0, 0)),
            pl.BlockSpec((1, Cr), lambda i: (0, 0)),
        ],
        out_specs=pl.BlockSpec((tm, Cr), lambda i: (i, 0)),
        compiler_params=pltpu.CompilerParams(dimension_semantics=("parallel",)),
    )(x2, s2, b2)
    return out[:Mr].reshape(B, L, C)


# ------------------------------- RMSNorm kernel ------------------------------

def _rmsnorm_kernel(x_ref, w_ref, o_ref, *, eps):
    x = x_ref[...].astype(jnp.float32)
    ms = jnp.mean(x * x, axis=-1, keepdims=True)
    o_ref[...] = (x * lax.rsqrt(ms + eps)
                  * w_ref[...].astype(jnp.float32)).astype(o_ref.dtype)


def rmsnorm(x, w, eps=_RMS_EPS):
    B, S, D = x.shape
    M = B * S
    tm = min(512, _round_up(M, 8))
    Mp = _round_up(M, tm)
    x2 = x.reshape(M, D)
    if Mp != M:
        x2 = jnp.pad(x2, ((0, Mp - M), (0, 0)))
    out = pl.pallas_call(
        functools.partial(_rmsnorm_kernel, eps=eps),
        out_shape=jax.ShapeDtypeStruct((Mp, D), x.dtype),
        grid=(Mp // tm,),
        in_specs=[
            pl.BlockSpec((tm, D), lambda i: (i, 0)),
            pl.BlockSpec((1, D), lambda i: (0, 0)),
        ],
        out_specs=pl.BlockSpec((tm, D), lambda i: (i, 0)),
        compiler_params=pltpu.CompilerParams(dimension_semantics=("parallel",)),
    )(x2, w.reshape(1, D))
    return out[:M].reshape(B, S, D)


# ------------------- fused transformer block (one pallas_call) ---------------

def _attention_block_kernel(x_ref, ln1_ref, wqkv_ref, bqkv_ref, wo_ref, bo_ref,
                            ln2_ref, w1_ref, b1_ref, w2_ref, b2_ref, o_ref,
                            *, n_heads, eps):
    f32, bf16 = jnp.float32, jnp.bfloat16
    x = x_ref[...].astype(f32)                              # (S, D)
    _, D = x.shape
    Dh = D // n_heads
    scale = 1.0 / math.sqrt(Dh)

    # ---- pre-norm 1 + fused QKV projection ----
    h = x * lax.rsqrt(jnp.mean(x * x, axis=-1, keepdims=True) + eps)
    h = h * ln1_ref[...].astype(f32)
    qkv = jnp.dot(h.astype(bf16), wqkv_ref[...].astype(bf16),
                  preferred_element_type=f32) + bqkv_ref[...]   # (S, 3D)
    q = qkv[:, :D] * scale        # fold 1/sqrt(Dh) into q, not the SxS scores
    k = qkv[:, D:2 * D]
    v = qkv[:, 2 * D:]

    # ---- multi-head attention: all heads in this grid step ----
    heads = []
    for hd in range(n_heads):
        sl = slice(hd * Dh, (hd + 1) * Dh)
        qh, kh, vh = q[:, sl], k[:, sl], v[:, sl]
        # contract on Dh directly (transpose folds into the MXU)
        s = lax.dot_general(qh.astype(bf16), kh.astype(bf16),
                            (((1,), (1,)), ((), ())),
                            preferred_element_type=f32)          # (S, S)
        m = jnp.max(s, axis=-1, keepdims=True)
        p = jnp.exp(s - m)
        l = jnp.sum(p, axis=-1, keepdims=True)
        p = p * pl.reciprocal(l, approx=True)
        heads.append(jnp.dot(p.astype(bf16), vh.astype(bf16),
                             preferred_element_type=f32))        # (S, Dh)
    attn = jnp.concatenate(heads, axis=-1)                       # (S, D) lane-dense

    o = jnp.dot(attn.astype(bf16), wo_ref[...].astype(bf16),
                preferred_element_type=f32) + bo_ref[...]
    x1 = x + o                                                   # residual 1

    # ---- pre-norm 2 + MLP (w1 -> ReLU -> w2) + residual ----
    h2 = x1 * lax.rsqrt(jnp.mean(x1 * x1, axis=-1, keepdims=True) + eps)
    h2 = h2 * ln2_ref[...].astype(f32)
    a = jnp.dot(h2.astype(bf16), w1_ref[...].astype(bf16),
                preferred_element_type=f32) + b1_ref[...]
    a = jnp.maximum(a, 0.0)
    y = jnp.dot(a.astype(bf16), w2_ref[...].astype(bf16),
                preferred_element_type=f32) + b2_ref[...]
    o_ref[...] = (x1 + y).astype(o_ref.dtype)


def attention_block(x, p, n_heads, eps=_RMS_EPS):
    # TODO(synk): AttentionBlock internals are not given in the reference; this
    # is a standard pre-norm block (RMSNorm -> MHSA -> residual, RMSNorm ->
    # 4x MLP with ReLU -> residual); drop=0.0 so dropout is identity.
    B, S, D = x.shape
    hid = p["w1"].shape[1]
    tok_spec = pl.BlockSpec((None, S, D), lambda b: (b, 0, 0))

    def full(shape):
        return pl.BlockSpec(shape, lambda b: (0,) * len(shape))

    return pl.pallas_call(
        functools.partial(_attention_block_kernel, n_heads=n_heads, eps=eps),
        out_shape=jax.ShapeDtypeStruct((B, S, D), x.dtype),
        grid=(B,),
        in_specs=[
            tok_spec,
            full((1, D)),                          # ln1
            full((D, 3 * D)), full((1, 3 * D)),    # wqkv, bqkv
            full((D, D)), full((1, D)),            # wo, bo
            full((1, D)),                          # ln2
            full((D, hid)), full((1, hid)),        # w1, b1
            full((hid, D)), full((1, D)),          # w2, b2
        ],
        out_specs=tok_spec,
        compiler_params=pltpu.CompilerParams(dimension_semantics=("parallel",)),
    )(x, p["ln1"].reshape(1, D), p["wqkv"], p["bqkv"].reshape(1, 3 * D),
      p["wo"], p["bo"].reshape(1, D), p["ln2"].reshape(1, D),
      p["w1"], p["b1"].reshape(1, hid), p["w2"], p["b2"].reshape(1, D))


# --------------------------------- JAX glue ----------------------------------

def conv1d(x, w, b, stride, pad):
    """Channels-last Conv1d via im2col + tiled Pallas matmul.

    x: (B, L, Cin); w: (Cout, Cin, K) in PyTorch layout; b: (Cout,)."""
    # TODO(synk): an in-kernel K-tap accumulation (fusing previous BN+ReLU into
    # the input load) would remove the im2col read amplification; kept as a JAX
    # gather here because conv zero-padding interacts with the fused BN shift.
    B, L, Cin = x.shape
    Cout, Cin2, K = w.shape
    assert Cin == Cin2
    xp = jnp.pad(x, ((0, 0), (pad, pad), (0, 0)))
    L_out = (L + 2 * pad - K) // stride + 1
    starts = jnp.arange(L_out) * stride
    gather = starts[:, None] + jnp.arange(K)[None, :]           # (L_out, K)
    patches = xp[:, gather, :].reshape(B * L_out, K * Cin)      # (B*L_out, K*Cin)
    w_mat = jnp.transpose(w, (2, 1, 0)).reshape(K * Cin, Cout)  # k*Cin+c order
    y = matmul_bias(patches, w_mat, b)                          # Pallas matmul
    return y.reshape(B, L_out, Cout)


def make_pos_table(length, d_model, base=10000.0):
    # TODO(synk): the RoPE class body is not provided in the reference; it is
    # *added* (`x + self.pos_emb[:, :L]`), so a deterministic interleaved
    # sin/cos table with RoPE frequencies base^(-2i/d) is used here.
    half = d_model // 2
    inv_freq = base ** (-jnp.arange(half, dtype=jnp.float32) * 2.0 / d_model)
    pos = jnp.arange(length, dtype=jnp.float32)
    ang = pos[:, None] * inv_freq[None, :]                      # (length, half)
    return jnp.stack([jnp.sin(ang), jnp.cos(ang)], axis=-1).reshape(length, d_model)


def transformer_model(x, params, n_heads=4):
    """Mirrors TransformerModel.forward (context_indices=None, out_dim=None)."""
    h = x                                             # (B, L, in_dim), channels-last
    for i, ((stride, pad), c) in enumerate(zip(CONV_STRIDE_PAD, params["conv"])):
        h = conv1d(h, c["w"], c["b"], stride, pad)
        if i < len(params["bn"]):                     # BN + ReLU after conv1, conv2
            bn = params["bn"][i]
            h = batchnorm_relu(h, bn["gamma"], bn["beta"])
    B, S, D = h.shape
    h = h + make_pos_table(S, D)[None]                # x + pos_emb[:, :L]
    for blk in params["blocks"]:
        h = attention_block(h, blk, n_heads)
    return rmsnorm(h, params["norm"])                 # self.lin is None (out_dim=None)


def init_params(key, in_dim, d_model, nlayers):
    std = 0.02
    keys = iter(jax.random.split(key, 8 + 5 * nlayers))
    params = {"conv": [], "bn": [], "blocks": []}
    conv_shapes = [(d_model, in_dim, 7), (d_model, d_model, 5), (d_model, d_model, 3)]
    for cout, cin, k in conv_shapes:
        params["conv"].append({
            "w": jax.random.normal(next(keys), (cout, cin, k), jnp.float32) * std,
            "b": jnp.zeros((cout,), jnp.float32),
        })
    for _ in range(2):
        params["bn"].append({"gamma": jnp.ones((d_model,), jnp.float32),
                             "beta": jnp.zeros((d_model,), jnp.float32)})
    hidden = 4 * d_model
    for _ in range(nlayers):
        params["blocks"].append({
            "ln1": jnp.ones((d_model,), jnp.float32),
            "wqkv": jax.random.normal(next(keys), (d_model, 3 * d_model),
                                      jnp.float32) * std,
            "bqkv": jnp.zeros((3 * d_model,), jnp.float32),
            "wo": jax.random.normal(next(keys), (d_model, d_model), jnp.float32) * std,
            "bo": jnp.zeros((d_model,), jnp.float32),
            "ln2": jnp.ones((d_model,), jnp.float32),
            "w1": jax.random.normal(next(keys), (d_model, hidden), jnp.float32) * std,
            "b1": jnp.zeros((hidden,), jnp.float32),
            "w2": jax.random.normal(next(keys), (hidden, d_model), jnp.float32) * std,
            "b2": jnp.zeros((d_model,), jnp.float32),
        })
    params["norm"] = jnp.ones((d_model,), jnp.float32)
    return params


if __name__ == "__main__":
    batch, seq_len, in_dim, d_model, n_heads, nlayers = 2, 64, 3, 32, 4, 3
    key = jax.random.PRNGKey(0)
    kx, kp = jax.random.split(key)
    x = jax.random.uniform(kx, (batch, seq_len, in_dim), jnp.float32)
    params = init_params(kp, in_dim, d_model, nlayers)

    fwd = jax.jit(functools.partial(transformer_model, n_heads=n_heads))
    out = jax.block_until_ready(fwd(x, params))

    # seq_len is downsampled by 8 (three stride-2 convs): 64 -> 8
    assert out.shape == (batch, seq_len // 8, d_model), out.shape
    assert bool(jnp.all(jnp.isfinite(out)))
    print("KERNEL_OK")
</pallas_src>

<mosaic_0001>
module attributes {stable_mosaic.version = 11 : i64} {
  func.func @_matmul_bias_kernel(%arg0: i32, %arg1: i32, %arg2: i32, %arg3: memref<64x128xf32, #tpu.memory_space<vmem>>, %arg4: memref<128x128xf32, #tpu.memory_space<vmem>>, %arg5: memref<1x128xf32, #tpu.memory_space<vmem>>, %arg6: memref<64x128xf32, #tpu.memory_space<vmem>>, %arg7: memref<64x128xf32, #tpu.memory_space<vmem>>) attributes {dimension_semantics = [#tpu.dimension_semantics<parallel>, #tpu.dimension_semantics<parallel>, #tpu.dimension_semantics<arbitrary>], iteration_bounds = array<i64: 1, 1, 1>, scalar_prefetch = 0 : i64, scratch_operands = 1 : i64, tpu.core_type = #tpu.core_type<tc>, window_params = [{transform_indices = @transform_0, window_bounds = array<i64: 64, 128>}, {transform_indices = @transform_1, window_bounds = array<i64: 128, 128>}, {transform_indices = @transform_2, window_bounds = array<i64: 1, 128>}, {transform_indices = @transform_3, window_bounds = array<i64: 64, 128>}]} {
    %c0_i32 = arith.constant 0 : i32
    %0 = arith.cmpi eq, %arg2, %c0_i32 : i32
    %1 = arith.extui %0 : i1 to i32
    %c0_i32_0 = arith.constant 0 : i32
    %2 = arith.cmpi ne, %1, %c0_i32_0 : i32
    scf.if %2 {
      %cst_10 = arith.constant 0.000000e+00 : f32
      %14 = vector.broadcast %cst_10 : f32 to vector<64x128xf32>
      %c0_11 = arith.constant 0 : index
      %c0_12 = arith.constant 0 : index
      %15 = vector.load %arg7[%c0_11, %c0_12] : memref<64x128xf32, #tpu.memory_space<vmem>>, vector<64x128xf32>
      tpu.vector_store %arg7[%c0_11, %c0_12], %14 {strides = array<i32>} : memref<64x128xf32, #tpu.memory_space<vmem>>, vector<64x128xf32>,
    } else {
    }
    %c0 = arith.constant 0 : index
    %c0_1 = arith.constant 0 : index
    %3 = vector.load %arg7[%c0, %c0_1] : memref<64x128xf32, #tpu.memory_space<vmem>>, vector<64x128xf32>
    %c0_2 = arith.constant 0 : index
    %c0_3 = arith.constant 0 : index
    %4 = vector.load %arg3[%c0_2, %c0_3] : memref<64x128xf32, #tpu.memory_space<vmem>>, vector<64x128xf32>
    %5 = arith.truncf %4 : vector<64x128xf32> to vector<64x128xbf16>
    %c0_4 = arith.constant 0 : index
    %c0_5 = arith.constant 0 : index
    %6 = vector.load %arg4[%c0_4, %c0_5] : memref<128x128xf32, #tpu.memory_space<vmem>>, vector<128x128xf32>
    %7 = arith.truncf %6 : vector<128x128xf32> to vector<128x128xbf16>
    %cst = arith.constant dense<0.000000e+00> : vector<64x128xf32>
    %8 = tpu.matmul %5, %7, %cst {dimension_numbers = #tpu.dot_dimension_numbers<[1], [0], [0], [1], [0, 0, 1, 1], [], []>} : vector<64x128xbf16>, vector<128x128xbf16>, vector<64x128xf32> -> vector<64x128xf32>
    %9 = arith.addf %3, %8 : vector<64x128xf32>
    %c0_6 = arith.constant 0 : index
    %c0_7 = arith.constant 0 : index
    %10 = vector.load %arg7[%c0_6, %c0_7] : memref<64x128xf32, #tpu.memory_space<vmem>>, vector<64x128xf32>
    tpu.vector_store %arg7[%c0_6, %c0_7], %9 {strides = array<i32>} : memref<64x128xf32, #tpu.memory_space<vmem>>, vector<64x128xf32>,
    %c0_i32_8 = arith.constant 0 : i32
    %11 = arith.cmpi eq, %arg2, %c0_i32_8 : i32
    %12 = arith.extui %11 : i1 to i32
    %c0_i32_9 = arith.constant 0 : i32
    %13 = arith.cmpi ne, %12, %c0_i32_9 : i32
    scf.if %13 {
      %c0_10 = arith.constant 0 : index
      %c0_11 = arith.constant 0 : index
      %14 = vector.load %arg7[%c0_10, %c0_11] : memref<64x128xf32, #tpu.memory_space<vmem>>, vector<64x128xf32>
      %c0_12 = arith.constant 0 : index
      %c0_13 = arith.constant 0 : index
      %15 = vector.load %arg5[%c0_12, %c0_13] : memref<1x128xf32, #tpu.memory_space<vmem>>, vector<1x128xf32>
      %16 = vector.broadcast %15 : vector<1x128xf32> to vector<64x128xf32>
      %17 = arith.addf %14, %16 : vector<64x128xf32>
      %c0_14 = arith.constant 0 : index
      %c0_15 = arith.constant 0 : index
      %18 = vector.load %arg6[%c0_14, %c0_15] : memref<64x128xf32, #tpu.memory_space<vmem>>, vector<64x128xf32>
      tpu.vector_store %arg6[%c0_14, %c0_15], %17 {strides = array<i32>} : memref<64x128xf32, #tpu.memory_space<vmem>>, vector<64x128xf32>,
    } else {
    }
    return
  }
  func.func @transform_0(%arg0: i32, %arg1: i32, %arg2: i32) -> (i32, i32) {
    %c0_i32 = arith.constant 0 : i32
    return %arg0, %arg2 : i32, i32
  }
  func.func @transform_1(%arg0: i32, %arg1: i32, %arg2: i32) -> (i32, i32) {
    %c0_i32 = arith.constant 0 : i32
    return %arg2, %arg1 : i32, i32
  }
  func.func @transform_2(%arg0: i32, %arg1: i32, %arg2: i32) -> (i32, i32) {
    %c0_i32 = arith.constant 0 : i32
    %c0_i32_0 = arith.constant 0 : i32
    return %c0_i32, %arg1 : i32, i32
  }
  func.func @transform_3(%arg0: i32, %arg1: i32, %arg2: i32) -> (i32, i32) {
    %c0_i32 = arith.constant 0 : i32
    return %arg0, %arg1 : i32, i32
  }
}

module attributes {stable_mosaic.version = 11 : i64} {
  func.func @_scale_shift_relu_kernel(%arg0: i32, %arg1: memref<16x128xf32, #tpu.memory_space<vmem>>, %arg2: memref<1x128xf32, #tpu.memory_space<vmem>>, %arg3: memref<1x128xf32, #tpu.memory_space<vmem>>, %arg4: memref<16x128xf32, #tpu.memory_space<vmem>>) attributes {dimension_semantics = [#tpu.dimension_semantics<parallel>], iteration_bounds = array<i64: 1>, scalar_prefetch = 0 : i64, scratch_operands = 0 : i64, tpu.core_type = #tpu.core_type<tc>, window_params = [{transform_indices = @transform_0, window_bounds = array<i64: 16, 128>}, {pipeline_mode = #tpu.pipeline_mode<synchronous>, transform_indices = @transform_1, window_bounds = array<i64: 1, 128>}, {pipeline_mode = #tpu.pipeline_mode<synchronous>, transform_indices = @transform_2, window_bounds = array<i64: 1, 128>}, {transform_indices = @transform_3, window_bounds = array<i64: 16, 128>}]} {
    %c0 = arith.constant 0 : index
    %c0_0 = arith.constant 0 : index
    %0 = vector.load %arg1[%c0, %c0_0] : memref<16x128xf32, #tpu.memory_space<vmem>>, vector<16x128xf32>
    %c0_1 = arith.constant 0 : index
    %c0_2 = arith.constant 0 : index
    %1 = vector.load %arg2[%c0_1, %c0_2] : memref<1x128xf32, #tpu.memory_space<vmem>>, vector<1x128xf32>
    %2 = vector.broadcast %1 : vector<1x128xf32> to vector<16x128xf32>
    %3 = arith.mulf %0, %2 : vector<16x128xf32>
    %c0_3 = arith.constant 0 : index
    %c0_4 = arith.constant 0 : index
    %4 = vector.load %arg3[%c0_3, %c0_4] : memref<1x128xf32, #tpu.memory_space<vmem>>, vector<1x128xf32>
    %5 = vector.broadcast %4 : vector<1x128xf32> to vector<16x128xf32>
    %6 = arith.addf %3, %5 : vector<16x128xf32>
    %cst = arith.constant 0.000000e+00 : f32
    %7 = vector.broadcast %cst : f32 to vector<16x128xf32>
    %8 = arith.maximumf %6, %7 : vector<16x128xf32>
    %c0_5 = arith.constant 0 : index
    %c0_6 = arith.constant 0 : index
    %9 = vector.load %arg4[%c0_5, %c0_6] : memref<16x128xf32, #tpu.memory_space<vmem>>, vector<16x128xf32>
    tpu.vector_store %arg4[%c0_5, %c0_6], %8 {strides = array<i32>} : memref<16x128xf32, #tpu.memory_space<vmem>>, vector<16x128xf32>,
    return
  }
  func.func @transform_0(%arg0: i32) -> (i32, i32) {
    %c0_i32 = arith.constant 0 : i32
    %c0_i32_0 = arith.constant 0 : i32
    return %arg0, %c0_i32 : i32, i32
  }
  func.func @transform_1(%arg0: i32) -> (i32, i32) {
    %c0_i32 = arith.constant 0 : i32
    %c0_i32_0 = arith.constant 0 : i32
    %c0_i32_1 = arith.constant 0 : i32
    return %c0_i32, %c0_i32_0 : i32, i32
  }
  func.func @transform_2(%arg0: i32) -> (i32, i32) {
    %c0_i32 = arith.constant 0 : i32
    %c0_i32_0 = arith.constant 0 : i32
    %c0_i32_1 = arith.constant 0 : i32
    return %c0_i32, %c0_i32_0 : i32, i32
  }
  func.func @transform_3(%arg0: i32) -> (i32, i32) {
    %c0_i32 = arith.constant 0 : i32
    %c0_i32_0 = arith.constant 0 : i32
    return %arg0, %c0_i32 : i32, i32
  }
}

module attributes {stable_mosaic.version = 11 : i64} {
  func.func @_matmul_bias_kernel(%arg0: i32, %arg1: i32, %arg2: i32, %arg3: memref<32x256xf32, #tpu.memory_space<vmem>>, %arg4: memref<256x128xf32, #tpu.memory_space<vmem>>, %arg5: memref<1x128xf32, #tpu.memory_space<vmem>>, %arg6: memref<32x128xf32, #tpu.memory_space<vmem>>, %arg7: memref<32x128xf32, #tpu.memory_space<vmem>>) attributes {dimension_semantics = [#tpu.dimension_semantics<parallel>, #tpu.dimension_semantics<parallel>, #tpu.dimension_semantics<arbitrary>], iteration_bounds = array<i64: 1, 1, 1>, scalar_prefetch = 0 : i64, scratch_operands = 1 : i64, tpu.core_type = #tpu.core_type<tc>, window_params = [{transform_indices = @transform_0, window_bounds = array<i64: 32, 256>}, {transform_indices = @transform_1, window_bounds = array<i64: 256, 128>}, {transform_indices = @transform_2, window_bounds = array<i64: 1, 128>}, {transform_indices = @transform_3, window_bounds = array<i64: 32, 128>}]} {
    %c0_i32 = arith.constant 0 : i32
    %0 = arith.cmpi eq, %arg2, %c0_i32 : i32
    %1 = arith.extui %0 : i1 to i32
    %c0_i32_0 = arith.constant 0 : i32
    %2 = arith.cmpi ne, %1, %c0_i32_0 : i32
    scf.if %2 {
      %cst_10 = arith.constant 0.000000e+00 : f32
      %14 = vector.broadcast %cst_10 : f32 to vector<32x128xf32>
      %c0_11 = arith.constant 0 : index
      %c0_12 = arith.constant 0 : index
      %15 = vector.load %arg7[%c0_11, %c0_12] : memref<32x128xf32, #tpu.memory_space<vmem>>, vector<32x128xf32>
      tpu.vector_store %arg7[%c0_11, %c0_12], %14 {strides = array<i32>} : memref<32x128xf32, #tpu.memory_space<vmem>>, vector<32x128xf32>,
    } else {
    }
    %c0 = arith.constant 0 : index
    %c0_1 = arith.constant 0 : index
    %3 = vector.load %arg7[%c0, %c0_1] : memref<32x128xf32, #tpu.memory_space<vmem>>, vector<32x128xf32>
    %c0_2 = arith.constant 0 : index
    %c0_3 = arith.constant 0 : index
    %4 = vector.load %arg3[%c0_2, %c0_3] : memref<32x256xf32, #tpu.memory_space<vmem>>, vector<32x256xf32>
    %5 = arith.truncf %4 : vector<32x256xf32> to vector<32x256xbf16>
    %c0_4 = arith.constant 0 : index
    %c0_5 = arith.constant 0 : index
    %6 = vector.load %arg4[%c0_4, %c0_5] : memref<256x128xf32, #tpu.memory_space<vmem>>, vector<256x128xf32>
    %7 = arith.truncf %6 : vector<256x128xf32> to vector<256x128xbf16>
    %cst = arith.constant dense<0.000000e+00> : vector<32x128xf32>
    %8 = tpu.matmul %5, %7, %cst {dimension_numbers = #tpu.dot_dimension_numbers<[1], [0], [0], [1], [0, 0, 1, 1], [], []>} : vector<32x256xbf16>, vector<256x128xbf16>, vector<32x128xf32> -> vector<32x128xf32>
    %9 = arith.addf %3, %8 : vector<32x128xf32>
    %c0_6 = arith.constant 0 : index
    %c0_7 = arith.constant 0 : index
    %10 = vector.load %arg7[%c0_6, %c0_7] : memref<32x128xf32, #tpu.memory_space<vmem>>, vector<32x128xf32>
    tpu.vector_store %arg7[%c0_6, %c0_7], %9 {strides = array<i32>} : memref<32x128xf32, #tpu.memory_space<vmem>>, vector<32x128xf32>,
    %c0_i32_8 = arith.constant 0 : i32
    %11 = arith.cmpi eq, %arg2, %c0_i32_8 : i32
    %12 = arith.extui %11 : i1 to i32
    %c0_i32_9 = arith.constant 0 : i32
    %13 = arith.cmpi ne, %12, %c0_i32_9 : i32
    scf.if %13 {
      %c0_10 = arith.constant 0 : index
      %c0_11 = arith.constant 0 : index
      %14 = vector.load %arg7[%c0_10, %c0_11] : memref<32x128xf32, #tpu.memory_space<vmem>>, vector<32x128xf32>
      %c0_12 = arith.constant 0 : index
      %c0_13 = arith.constant 0 : index
      %15 = vector.load %arg5[%c0_12, %c0_13] : memref<1x128xf32, #tpu.memory_space<vmem>>, vector<1x128xf32>
      %16 = vector.broadcast %15 : vector<1x128xf32> to vector<32x128xf32>
      %17 = arith.addf %14, %16 : vector<32x128xf32>
      %c0_14 = arith.constant 0 : index
      %c0_15 = arith.constant 0 : index
      %18 = vector.load %arg6[%c0_14, %c0_15] : memref<32x128xf32, #tpu.memory_space<vmem>>, vector<32x128xf32>
      tpu.vector_store %arg6[%c0_14, %c0_15], %17 {strides = array<i32>} : memref<32x128xf32, #tpu.memory_space<vmem>>, vector<32x128xf32>,
    } else {
    }
    return
  }
  func.func @transform_0(%arg0: i32, %arg1: i32, %arg2: i32) -> (i32, i32) {
    %c0_i32 = arith.constant 0 : i32
    return %arg0, %arg2 : i32, i32
  }
  func.func @transform_1(%arg0: i32, %arg1: i32, %arg2: i32) -> (i32, i32) {
    %c0_i32 = arith.constant 0 : i32
    return %arg2, %arg1 : i32, i32
  }
  func.func @transform_2(%arg0: i32, %arg1: i32, %arg2: i32) -> (i32, i32) {
    %c0_i32 = arith.constant 0 : i32
    %c0_i32_0 = arith.constant 0 : i32
    return %c0_i32, %arg1 : i32, i32
  }
  func.func @transform_3(%arg0: i32, %arg1: i32, %arg2: i32) -> (i32, i32) {
    %c0_i32 = arith.constant 0 : i32
    return %arg0, %arg1 : i32, i32
  }
}

module attributes {stable_mosaic.version = 11 : i64} {
  func.func @_scale_shift_relu_kernel(%arg0: i32, %arg1: memref<8x128xf32, #tpu.memory_space<vmem>>, %arg2: memref<1x128xf32, #tpu.memory_space<vmem>>, %arg3: memref<1x128xf32, #tpu.memory_space<vmem>>, %arg4: memref<8x128xf32, #tpu.memory_space<vmem>>) attributes {dimension_semantics = [#tpu.dimension_semantics<parallel>], iteration_bounds = array<i64: 1>, scalar_prefetch = 0 : i64, scratch_operands = 0 : i64, tpu.core_type = #tpu.core_type<tc>, window_params = [{transform_indices = @transform_0, window_bounds = array<i64: 8, 128>}, {pipeline_mode = #tpu.pipeline_mode<synchronous>, transform_indices = @transform_1, window_bounds = array<i64: 1, 128>}, {pipeline_mode = #tpu.pipeline_mode<synchronous>, transform_indices = @transform_2, window_bounds = array<i64: 1, 128>}, {transform_indices = @transform_3, window_bounds = array<i64: 8, 128>}]} {
    %c0 = arith.constant 0 : index
    %c0_0 = arith.constant 0 : index
    %0 = vector.load %arg1[%c0, %c0_0] : memref<8x128xf32, #tpu.memory_space<vmem>>, vector<8x128xf32>
    %c0_1 = arith.constant 0 : index
    %c0_2 = arith.constant 0 : index
    %1 = vector.load %arg2[%c0_1, %c0_2] : memref<1x128xf32, #tpu.memory_space<vmem>>, vector<1x128xf32>
    %2 = vector.broadcast %1 : vector<1x128xf32> to vector<8x128xf32>
    %3 = arith.mulf %0, %2 : vector<8x128xf32>
    %c0_3 = arith.constant 0 : index
    %c0_4 = arith.constant 0 : index
    %4 = vector.load %arg3[%c0_3, %c0_4] : memref<1x128xf32, #tpu.memory_space<vmem>>, vector<1x128xf32>
    %5 = vector.broadcast %4 : vector<1x128xf32> to vector<8x128xf32>
    %6 = arith.addf %3, %5 : vector<8x128xf32>
    %cst = arith.constant 0.000000e+00 : f32
    %7 = vector.broadcast %cst : f32 to vector<8x128xf32>
    %8 = arith.maximumf %6, %7 : vector<8x128xf32>
    %c0_5 = arith.constant 0 : index
    %c0_6 = arith.constant 0 : index
    %9 = vector.load %arg4[%c0_5, %c0_6] : memref<8x128xf32, #tpu.memory_space<vmem>>, vector<8x128xf32>
    tpu.vector_store %arg4[%c0_5, %c0_6], %8 {strides = array<i32>} : memref<8x128xf32, #tpu.memory_space<vmem>>, vector<8x128xf32>,
    return
  }
  func.func @transform_0(%arg0: i32) -> (i32, i32) {
    %c0_i32 = arith.constant 0 : i32
    %c0_i32_0 = arith.constant 0 : i32
    return %arg0, %c0_i32 : i32, i32
  }
  func.func @transform_1(%arg0: i32) -> (i32, i32) {
    %c0_i32 = arith.constant 0 : i32
    %c0_i32_0 = arith.constant 0 : i32
    %c0_i32_1 = arith.constant 0 : i32
    return %c0_i32, %c0_i32_0 : i32, i32
  }
  func.func @transform_2(%arg0: i32) -> (i32, i32) {
    %c0_i32 = arith.constant 0 : i32
    %c0_i32_0 = arith.constant 0 : i32
    %c0_i32_1 = arith.constant 0 : i32
    return %c0_i32, %c0_i32_0 : i32, i32
  }
  func.func @transform_3(%arg0: i32) -> (i32, i32) {
    %c0_i32 = arith.constant 0 : i32
    %c0_i32_0 = arith.constant 0 : i32
    return %arg0, %c0_i32 : i32, i32
  }
}

module attributes {stable_mosaic.version = 11 : i64} {
  func.func @_matmul_bias_kernel(%arg0: i32, %arg1: i32, %arg2: i32, %arg3: memref<16x128xf32, #tpu.memory_space<vmem>>, %arg4: memref<128x128xf32, #tpu.memory_space<vmem>>, %arg5: memref<1x128xf32, #tpu.memory_space<vmem>>, %arg6: memref<16x128xf32, #tpu.memory_space<vmem>>, %arg7: memref<16x128xf32, #tpu.memory_space<vmem>>) attributes {dimension_semantics = [#tpu.dimension_semantics<parallel>, #tpu.dimension_semantics<parallel>, #tpu.dimension_semantics<arbitrary>], iteration_bounds = array<i64: 1, 1, 1>, scalar_prefetch = 0 : i64, scratch_operands = 1 : i64, tpu.core_type = #tpu.core_type<tc>, window_params = [{transform_indices = @transform_0, window_bounds = array<i64: 16, 128>}, {transform_indices = @transform_1, window_bounds = array<i64: 128, 128>}, {transform_indices = @transform_2, window_bounds = array<i64: 1, 128>}, {transform_indices = @transform_3, window_bounds = array<i64: 16, 128>}]} {
    %c0_i32 = arith.constant 0 : i32
    %0 = arith.cmpi eq, %arg2, %c0_i32 : i32
    %1 = arith.extui %0 : i1 to i32
    %c0_i32_0 = arith.constant 0 : i32
    %2 = arith.cmpi ne, %1, %c0_i32_0 : i32
    scf.if %2 {
      %cst_10 = arith.constant 0.000000e+00 : f32
      %14 = vector.broadcast %cst_10 : f32 to vector<16x128xf32>
      %c0_11 = arith.constant 0 : index
      %c0_12 = arith.constant 0 : index
      %15 = vector.load %arg7[%c0_11, %c0_12] : memref<16x128xf32, #tpu.memory_space<vmem>>, vector<16x128xf32>
      tpu.vector_store %arg7[%c0_11, %c0_12], %14 {strides = array<i32>} : memref<16x128xf32, #tpu.memory_space<vmem>>, vector<16x128xf32>,
    } else {
    }
    %c0 = arith.constant 0 : index
    %c0_1 = arith.constant 0 : index
    %3 = vector.load %arg7[%c0, %c0_1] : memref<16x128xf32, #tpu.memory_space<vmem>>, vector<16x128xf32>
    %c0_2 = arith.constant 0 : index
    %c0_3 = arith.constant 0 : index
    %4 = vector.load %arg3[%c0_2, %c0_3] : memref<16x128xf32, #tpu.memory_space<vmem>>, vector<16x128xf32>
    %5 = arith.truncf %4 : vector<16x128xf32> to vector<16x128xbf16>
    %c0_4 = arith.constant 0 : index
    %c0_5 = arith.constant 0 : index
    %6 = vector.load %arg4[%c0_4, %c0_5] : memref<128x128xf32, #tpu.memory_space<vmem>>, vector<128x128xf32>
    %7 = arith.truncf %6 : vector<128x128xf32> to vector<128x128xbf16>
    %cst = arith.constant dense<0.000000e+00> : vector<16x128xf32>
    %8 = tpu.matmul %5, %7, %cst {dimension_numbers = #tpu.dot_dimension_numbers<[1], [0], [0], [1], [0, 0, 1, 1], [], []>} : vector<16x128xbf16>, vector<128x128xbf16>, vector<16x128xf32> -> vector<16x128xf32>
    %9 = arith.addf %3, %8 : vector<16x128xf32>
    %c0_6 = arith.constant 0 : index
    %c0_7 = arith.constant 0 : index
    %10 = vector.load %arg7[%c0_6, %c0_7] : memref<16x128xf32, #tpu.memory_space<vmem>>, vector<16x128xf32>
    tpu.vector_store %arg7[%c0_6, %c0_7], %9 {strides = array<i32>} : memref<16x128xf32, #tpu.memory_space<vmem>>, vector<16x128xf32>,
    %c0_i32_8 = arith.constant 0 : i32
    %11 = arith.cmpi eq, %arg2, %c0_i32_8 : i32
    %12 = arith.extui %11 : i1 to i32
    %c0_i32_9 = arith.constant 0 : i32
    %13 = arith.cmpi ne, %12, %c0_i32_9 : i32
    scf.if %13 {
      %c0_10 = arith.constant 0 : index
      %c0_11 = arith.constant 0 : index
      %14 = vector.load %arg7[%c0_10, %c0_11] : memref<16x128xf32, #tpu.memory_space<vmem>>, vector<16x128xf32>
      %c0_12 = arith.constant 0 : index
      %c0_13 = arith.constant 0 : index
      %15 = vector.load %arg5[%c0_12, %c0_13] : memref<1x128xf32, #tpu.memory_space<vmem>>, vector<1x128xf32>
      %16 = vector.broadcast %15 : vector<1x128xf32> to vector<16x128xf32>
      %17 = arith.addf %14, %16 : vector<16x128xf32>
      %c0_14 = arith.constant 0 : index
      %c0_15 = arith.constant 0 : index
      %18 = vector.load %arg6[%c0_14, %c0_15] : memref<16x128xf32, #tpu.memory_space<vmem>>, vector<16x128xf32>
      tpu.vector_store %arg6[%c0_14, %c0_15], %17 {strides = array<i32>} : memref<16x128xf32, #tpu.memory_space<vmem>>, vector<16x128xf32>,
    } else {
    }
    return
  }
  func.func @transform_0(%arg0: i32, %arg1: i32, %arg2: i32) -> (i32, i32) {
    %c0_i32 = arith.constant 0 : i32
    return %arg0, %arg2 : i32, i32
  }
  func.func @transform_1(%arg0: i32, %arg1: i32, %arg2: i32) -> (i32, i32) {
    %c0_i32 = arith.constant 0 : i32
    return %arg2, %arg1 : i32, i32
  }
  func.func @transform_2(%arg0: i32, %arg1: i32, %arg2: i32) -> (i32, i32) {
    %c0_i32 = arith.constant 0 : i32
    %c0_i32_0 = arith.constant 0 : i32
    return %c0_i32, %arg1 : i32, i32
  }
  func.func @transform_3(%arg0: i32, %arg1: i32, %arg2: i32) -> (i32, i32) {
    %c0_i32 = arith.constant 0 : i32
    return %arg0, %arg1 : i32, i32
  }
}

module attributes {stable_mosaic.version = 11 : i64} {
  func.func @_rmsnorm_kernel(%arg0: i32, %arg1: memref<16x32xf32, #tpu.memory_space<vmem>>, %arg2: memref<1x32xf32, #tpu.memory_space<vmem>>, %arg3: memref<16x32xf32, #tpu.memory_space<vmem>>) attributes {dimension_semantics = [#tpu.dimension_semantics<parallel>], iteration_bounds = array<i64: 1>, scalar_prefetch = 0 : i64, scratch_operands = 0 : i64, tpu.core_type = #tpu.core_type<tc>, window_params = [{transform_indices = @transform_0, window_bounds = array<i64: 16, 32>}, {pipeline_mode = #tpu.pipeline_mode<synchronous>, transform_indices = @transform_1, window_bounds = array<i64: 1, 32>}, {transform_indices = @transform_2, window_bounds = array<i64: 16, 32>}]} {
    %c0 = arith.constant 0 : index
    %c0_0 = arith.constant 0 : index
    %0 = vector.load %arg1[%c0, %c0_0] : memref<16x32xf32, #tpu.memory_space<vmem>>, vector<16x32xf32>
    %1 = arith.mulf %0, %0 : vector<16x32xf32>
    %cst = arith.constant dense<0.000000e+00> : vector<16xf32>
    %2 = vector.multi_reduction <add>, %1, %cst [1] : vector<16x32xf32> to vector<16xf32>
    %3 = vector.shape_cast %2 : vector<16xf32> to vector<16x1xf32>
    %cst_1 = arith.constant 3.200000e+01 : f32
    %4 = vector.broadcast %cst_1 : f32 to vector<16x1xf32>
    %5 = arith.divf %3, %4 : vector<16x1xf32>
    %cst_2 = arith.constant 1.1920929E-7 : f32
    %6 = vector.broadcast %cst_2 : f32 to vector<16x1xf32>
    %7 = arith.addf %5, %6 : vector<16x1xf32>
    %8 = math.rsqrt %7 : vector<16x1xf32>
    %9 = vector.broadcast %8 : vector<16x1xf32> to vector<16x32xf32>
    %10 = arith.mulf %0, %9 : vector<16x32xf32>
    %c0_3 = arith.constant 0 : index
    %c0_4 = arith.constant 0 : index
    %11 = vector.load %arg2[%c0_3, %c0_4] : memref<1x32xf32, #tpu.memory_space<vmem>>, vector<1x32xf32>
    %12 = vector.broadcast %11 : vector<1x32xf32> to vector<16x32xf32>
    %13 = arith.mulf %10, %12 : vector<16x32xf32>
    %c0_5 = arith.constant 0 : index
    %c0_6 = arith.constant 0 : index
    %14 = vector.load %arg3[%c0_5, %c0_6] : memref<16x32xf32, #tpu.memory_space<vmem>>, vector<16x32xf32>
    tpu.vector_store %arg3[%c0_5, %c0_6], %13 {strides = array<i32>} : memref<16x32xf32, #tpu.memory_space<vmem>>, vector<16x32xf32>,
    return
  }
  func.func @transform_0(%arg0: i32) -> (i32, i32) {
    %c0_i32 = arith.constant 0 : i32
    %c0_i32_0 = arith.constant 0 : i32
    return %arg0, %c0_i32 : i32, i32
  }
  func.func @transform_1(%arg0: i32) -> (i32, i32) {
    %c0_i32 = arith.constant 0 : i32
    %c0_i32_0 = arith.constant 0 : i32
    %c0_i32_1 = arith.constant 0 : i32
    return %c0_i32, %c0_i32_0 : i32, i32
  }
  func.func @transform_2(%arg0: i32) -> (i32, i32) {
    %c0_i32 = arith.constant 0 : i32
    %c0_i32_0 = arith.constant 0 : i32
    return %arg0, %c0_i32 : i32, i32
  }
}

module attributes {stable_mosaic.version = 11 : i64} {
  func.func @_attention_block_kernel(%arg0: i32, %arg1: memref<1x8x32xf32, #tpu.memory_space<vmem>>, %arg2: memref<1x32xf32, #tpu.memory_space<vmem>>, %arg3: memref<32x96xf32, #tpu.memory_space<vmem>>, %arg4: memref<1x96xf32, #tpu.memory_space<vmem>>, %arg5: memref<32x32xf32, #tpu.memory_space<vmem>>, %arg6: memref<1x32xf32, #tpu.memory_space<vmem>>, %arg7: memref<1x32xf32, #tpu.memory_space<vmem>>, %arg8: memref<32x128xf32, #tpu.memory_space<vmem>>, %arg9: memref<1x128xf32, #tpu.memory_space<vmem>>, %arg10: memref<128x32xf32, #tpu.memory_space<vmem>>, %arg11: memref<1x32xf32, #tpu.memory_space<vmem>>, %arg12: memref<1x8x32xf32, #tpu.memory_space<vmem>>) attributes {dimension_semantics = [#tpu.dimension_semantics<parallel>], iteration_bounds = array<i64: 2>, scalar_prefetch = 0 : i64, scratch_operands = 0 : i64, tpu.core_type = #tpu.core_type<tc>, window_params = [{transform_indices = @transform_0, window_bounds = array<i64: 1, 8, 32>}, {pipeline_mode = #tpu.pipeline_mode<synchronous>, transform_indices = @transform_1, window_bounds = array<i64: 1, 32>}, {pipeline_mode = #tpu.pipeline_mode<synchronous>, transform_indices = @transform_2, window_bounds = array<i64: 32, 96>}, {pipeline_mode = #tpu.pipeline_mode<synchronous>, transform_indices = @transform_3, window_bounds = array<i64: 1, 96>}, {pipeline_mode = #tpu.pipeline_mode<synchronous>, transform_indices = @transform_4, window_bounds = array<i64: 32, 32>}, {pipeline_mode = #tpu.pipeline_mode<synchronous>, transform_indices = @transform_5, window_bounds = array<i64: 1, 32>}, {pipeline_mode = #tpu.pipeline_mode<synchronous>, transform_indices = @transform_6, window_bounds = array<i64: 1, 32>}, {pipeline_mode = #tpu.pipeline_mode<synchronous>, transform_indices = @transform_7, window_bounds = array<i64: 32, 128>}, {pipeline_mode = #tpu.pipeline_mode<synchronous>, transform_indices = @transform_8, window_bounds = array<i64: 1, 128>}, {pipeline_mode = #tpu.pipeline_mode<synchronous>, transform_indices = @transform_9, window_bounds = array<i64: 128, 32>}, {pipeline_mode = #tpu.pipeline_mode<synchronous>, transform_indices = @transform_10, window_bounds = array<i64: 1, 32>}, {transform_indices = @transform_11, window_bounds = array<i64: 1, 8, 32>}]} {
    %c0 = arith.constant 0 : index
    %c0_0 = arith.constant 0 : index
    %c0_1 = arith.constant 0 : index
    %0 = vector.load %arg1[%c0, %c0_0, %c0_1] : memref<1x8x32xf32, #tpu.memory_space<vmem>>, vector<1x8x32xf32>
    %1 = vector.shape_cast %0 : vector<1x8x32xf32> to vector<8x32xf32>
    %2 = arith.mulf %1, %1 : vector<8x32xf32>
    %cst = arith.constant dense<0.000000e+00> : vector<8xf32>
    %3 = vector.multi_reduction <add>, %2, %cst [1] : vector<8x32xf32> to vector<8xf32>
    %4 = vector.shape_cast %3 : vector<8xf32> to vector<8x1xf32>
    %cst_2 = arith.constant 3.200000e+01 : f32
    %5 = vector.broadcast %cst_2 : f32 to vector<8x1xf32>
    %6 = arith.divf %4, %5 : vector<8x1xf32>
    %cst_3 = arith.constant 1.1920929E-7 : f32
    %7 = vector.broadcast %cst_3 : f32 to vector<8x1xf32>
    %8 = arith.addf %6, %7 : vector<8x1xf32>
    %9 = math.rsqrt %8 : vector<8x1xf32>
    %10 = vector.broadcast %9 : vector<8x1xf32> to vector<8x32xf32>
    %11 = arith.mulf %1, %10 : vector<8x32xf32>
    %c0_4 = arith.constant 0 : index
    %c0_5 = arith.constant 0 : index
    %12 = vector.load %arg2[%c0_4, %c0_5] : memref<1x32xf32, #tpu.memory_space<vmem>>, vector<1x32xf32>
    %13 = vector.broadcast %12 : vector<1x32xf32> to vector<8x32xf32>
    %14 = arith.mulf %11, %13 : vector<8x32xf32>
    %15 = arith.truncf %14 : vector<8x32xf32> to vector<8x32xbf16>
    %c0_6 = arith.constant 0 : index
    %c0_7 = arith.constant 0 : index
    %16 = vector.load %arg3[%c0_6, %c0_7] : memref<32x96xf32, #tpu.memory_space<vmem>>, vector<32x96xf32>
    %17 = arith.truncf %16 : vector<32x96xf32> to vector<32x96xbf16>
    %cst_8 = arith.constant dense<0.000000e+00> : vector<8x96xf32>
    %18 = tpu.matmul %15, %17, %cst_8 {dimension_numbers = #tpu.dot_dimension_numbers<[1], [0], [0], [1], [0, 0, 1, 1], [], []>} : vector<8x32xbf16>, vector<32x96xbf16>, vector<8x96xf32> -> vector<8x96xf32>
    %c0_9 = arith.constant 0 : index
    %c0_10 = arith.constant 0 : index
    %19 = vector.load %arg4[%c0_9, %c0_10] : memref<1x96xf32, #tpu.memory_space<vmem>>, vector<1x96xf32>
    %20 = vector.broadcast %19 : vector<1x96xf32> to vector<8x96xf32>
    %21 = arith.addf %18, %20 : vector<8x96xf32>
    %22 = vector.extract_strided_slice %21 {offsets = [0, 0], sizes = [8, 32], strides = [1, 1]} : vector<8x96xf32> to vector<8x32xf32>
    %cst_11 = arith.constant 0.353553385 : f32
    %23 = vector.broadcast %cst_11 : f32 to vector<8x32xf32>
    %24 = arith.mulf %22, %23 : vector<8x32xf32>
    %25 = vector.extract_strided_slice %21 {offsets = [0, 32], sizes = [8, 32], strides = [1, 1]} : vector<8x96xf32> to vector<8x32xf32>
    %26 = vector.extract_strided_slice %21 {offsets = [0, 64], sizes = [8, 32], strides = [1, 1]} : vector<8x96xf32> to vector<8x32xf32>
    %27 = vector.extract_strided_slice %24 {offsets = [0, 0], sizes = [8, 8], strides = [1, 1]} : vector<8x32xf32> to vector<8x8xf32>
    %28 = vector.extract_strided_slice %25 {offsets = [0, 0], sizes = [8, 8], strides = [1, 1]} : vector<8x32xf32> to vector<8x8xf32>
    %29 = vector.extract_strided_slice %26 {offsets = [0, 0], sizes = [8, 8], strides = [1, 1]} : vector<8x32xf32> to vector<8x8xf32>
    %30 = arith.truncf %27 : vector<8x8xf32> to vector<8x8xbf16>
    %31 = arith.truncf %28 : vector<8x8xf32> to vector<8x8xbf16>
    %cst_12 = arith.constant dense<0.000000e+00> : vector<8x8xf32>
    %32 = tpu.matmul %30, %31, %cst_12 {dimension_numbers = #tpu.dot_dimension_numbers<[1], [1], [0], [0], [0, 0, 1, 0], [], []>} : vector<8x8xbf16>, vector<8x8xbf16>, vector<8x8xf32> -> vector<8x8xf32>
    %cst_13 = arith.constant dense<0xFF800000> : vector<8xf32>
    %33 = vector.multi_reduction <maximumf>, %32, %cst_13 [1] : vector<8x8xf32> to vector<8xf32>
    %34 = vector.shape_cast %33 : vector<8xf32> to vector<8x1xf32>
    %35 = vector.broadcast %34 : vector<8x1xf32> to vector<8x8xf32>
    %36 = arith.subf %32, %35 : vector<8x8xf32>
    %37 = math.exp %36 : vector<8x8xf32>
    %cst_14 = arith.constant dense<0.000000e+00> : vector<8xf32>
    %38 = vector.multi_reduction <add>, %37, %cst_14 [1] : vector<8x8xf32> to vector<8xf32>
    %39 = vector.shape_cast %38 : vector<8xf32> to vector<8x1xf32>
    %40 = tpu.reciprocal %39 {approx = true} : vector<8x1xf32> -> vector<8x1xf32>
    %41 = vector.broadcast %40 : vector<8x1xf32> to vector<8x8xf32>
    %42 = arith.mulf %37, %41 : vector<8x8xf32>
    %43 = arith.truncf %42 : vector<8x8xf32> to vector<8x8xbf16>
    %44 = arith.truncf %29 : vector<8x8xf32> to vector<8x8xbf16>
    %cst_15 = arith.constant dense<0.000000e+00> : vector<8x8xf32>
    %45 = tpu.matmul %43, %44, %cst_15 {dimension_numbers = #tpu.dot_dimension_numbers<[1], [0], [0], [1], [0, 0, 1, 1], [], []>} : vector<8x8xbf16>, vector<8x8xbf16>, vector<8x8xf32> -> vector<8x8xf32>
    %46 = vector.extract_strided_slice %24 {offsets = [0, 8], sizes = [8, 8], strides = [1, 1]} : vector<8x32xf32> to vector<8x8xf32>
    %47 = vector.extract_strided_slice %25 {offsets = [0, 8], sizes = [8, 8], strides = [1, 1]} : vector<8x32xf32> to vector<8x8xf32>
    %48 = vector.extract_strided_slice %26 {offsets = [0, 8], sizes = [8, 8], strides = [1, 1]} : vector<8x32xf32> to vector<8x8xf32>
    %49 = arith.truncf %46 : vector<8x8xf32> to vector<8x8xbf16>
    %50 = arith.truncf %47 : vector<8x8xf32> to vector<8x8xbf16>
    %cst_16 = arith.constant dense<0.000000e+00> : vector<8x8xf32>
    %51 = tpu.matmul %49, %50, %cst_16 {dimension_numbers = #tpu.dot_dimension_numbers<[1], [1], [0], [0], [0, 0, 1, 0], [], []>} : vector<8x8xbf16>, vector<8x8xbf16>, vector<8x8xf32> -> vector<8x8xf32>
    %cst_17 = arith.constant dense<0xFF800000> : vector<8xf32>
    %52 = vector.multi_reduction <maximumf>, %51, %cst_17 [1] : vector<8x8xf32> to vector<8xf32>
    %53 = vector.shape_cast %52 : vector<8xf32> to vector<8x1xf32>
    %54 = vector.broadcast %53 : vector<8x1xf32> to vector<8x8xf32>
    %55 = arith.subf %51, %54 : vector<8x8xf32>
    %56 = math.exp %55 : vector<8x8xf32>
    %cst_18 = arith.constant dense<0.000000e+00> : vector<8xf32>
    %57 = vector.multi_reduction <add>, %56, %cst_18 [1] : vector<8x8xf32> to vector<8xf32>
    %58 = vector.shape_cast %57 : vector<8xf32> to vector<8x1xf32>
    %59 = tpu.reciprocal %58 {approx = true} : vector<8x1xf32> -> vector<8x1xf32>
    %60 = vector.broadcast %59 : vector<8x1xf32> to vector<8x8xf32>
    %61 = arith.mulf %56, %60 : vector<8x8xf32>
    %62 = arith.truncf %61 : vector<8x8xf32> to vector<8x8xbf16>
    %63 = arith.truncf %48 : vector<8x8xf32> to vector<8x8xbf16>
    %cst_19 = arith.constant dense<0.000000e+00> : vector<8x8xf32>
    %64 = tpu.matmul %62, %63, %cst_19 {dimension_numbers = #tpu.dot_dimension_numbers<[1], [0], [0], [1], [0, 0, 1, 1], [], []>} : vector<8x8xbf16>, vector<8x8xbf16>, vector<8x8xf32> -> vector<8x8xf32>
    %65 = vector.extract_strided_slice %24 {offsets = [0, 16], sizes = [8, 8], strides = [1, 1]} : vector<8x32xf32> to vector<8x8xf32>
    %66 = vector.extract_strided_slice %25 {offsets = [0, 16], sizes = [8, 8], strides = [1, 1]} : vector<8x32xf32> to vector<8x8xf32>
    %67 = vector.extract_strided_slice %26 {offsets = [0, 16], sizes = [8, 8], strides = [1, 1]} : vector<8x32xf32> to vector<8x8xf32>
    %68 = arith.truncf %65 : vector<8x8xf32> to vector<8x8xbf16>
    %69 = arith.truncf %66 : vector<8x8xf32> to vector<8x8xbf16>
    %cst_20 = arith.constant dense<0.000000e+00> : vector<8x8xf32>
    %70 = tpu.matmul %68, %69, %cst_20 {dimension_numbers = #tpu.dot_dimension_numbers<[1], [1], [0], [0], [0, 0, 1, 0], [], []>} : vector<8x8xbf16>, vector<8x8xbf16>, vector<8x8xf32> -> vector<8x8xf32>
    %cst_21 = arith.constant dense<0xFF800000> : vector<8xf32>
    %71 = vector.multi_reduction <maximumf>, %70, %cst_21 [1] : vector<8x8xf32> to vector<8xf32>
    %72 = vector.shape_cast %71 : vector<8xf32> to vector<8x1xf32>
    %73 = vector.broadcast %72 : vector<8x1xf32> to vector<8x8xf32>
    %74 = arith.subf %70, %73 : vector<8x8xf32>
    %75 = math.exp %74 : vector<8x8xf32>
    %cst_22 = arith.constant dense<0.000000e+00> : vector<8xf32>
    %76 = vector.multi_reduction <add>, %75, %cst_22 [1] : vector<8x8xf32> to vector<8xf32>
    %77 = vector.shape_cast %76 : vector<8xf32> to vector<8x1xf32>
    %78 = tpu.reciprocal %77 {approx = true} : vector<8x1xf32> -> vector<8x1xf32>
    %79 = vector.broadcast %78 : vector<8x1xf32> to vector<8x8xf32>
    %80 = arith.mulf %75, %79 : vector<8x8xf32>
    %81 = arith.truncf %80 : vector<8x8xf32> to vector<8x8xbf16>
    %82 = arith.truncf %67 : vector<8x8xf32> to vector<8x8xbf16>
    %cst_23 = arith.constant dense<0.000000e+00> : vector<8x8xf32>
    %83 = tpu.matmul %81, %82, %cst_23 {dimension_numbers = #tpu.dot_dimension_numbers<[1], [0], [0], [1], [0, 0, 1, 1], [], []>} : vector<8x8xbf16>, vector<8x8xbf16>, vector<8x8xf32> -> vector<8x8xf32>
    %84 = vector.extract_strided_slice %24 {offsets = [0, 24], sizes = [8, 8], strides = [1, 1]} : vector<8x32xf32> to vector<8x8xf32>
    %85 = vector.extract_strided_slice %25 {offsets = [0, 24], sizes = [8, 8], strides = [1, 1]} : vector<8x32xf32> to vector<8x8xf32>
    %86 = vector.extract_strided_slice %26 {offsets = [0, 24], sizes = [8, 8], strides = [1, 1]} : vector<8x32xf32> to vector<8x8xf32>
    %87 = arith.truncf %84 : vector<8x8xf32> to vector<8x8xbf16>
    %88 = arith.truncf %85 : vector<8x8xf32> to vector<8x8xbf16>
    %cst_24 = arith.constant dense<0.000000e+00> : vector<8x8xf32>
    %89 = tpu.matmul %87, %88, %cst_24 {dimension_numbers = #tpu.dot_dimension_numbers<[1], [1], [0], [0], [0, 0, 1, 0], [], []>} : vector<8x8xbf16>, vector<8x8xbf16>, vector<8x8xf32> -> vector<8x8xf32>
    %cst_25 = arith.constant dense<0xFF800000> : vector<8xf32>
    %90 = vector.multi_reduction <maximumf>, %89, %cst_25 [1] : vector<8x8xf32> to vector<8xf32>
    %91 = vector.shape_cast %90 : vector<8xf32> to vector<8x1xf32>
    %92 = vector.broadcast %91 : vector<8x1xf32> to vector<8x8xf32>
    %93 = arith.subf %89, %92 : vector<8x8xf32>
    %94 = math.exp %93 : vector<8x8xf32>
    %cst_26 = arith.constant dense<0.000000e+00> : vector<8xf32>
    %95 = vector.multi_reduction <add>, %94, %cst_26 [1] : vector<8x8xf32> to vector<8xf32>
    %96 = vector.shape_cast %95 : vector<8xf32> to vector<8x1xf32>
    %97 = tpu.reciprocal %96 {approx = true} : vector<8x1xf32> -> vector<8x1xf32>
    %98 = vector.broadcast %97 : vector<8x1xf32> to vector<8x8xf32>
    %99 = arith.mulf %94, %98 : vector<8x8xf32>
    %100 = arith.truncf %99 : vector<8x8xf32> to vector<8x8xbf16>
    %101 = arith.truncf %86 : vector<8x8xf32> to vector<8x8xbf16>
    %cst_27 = arith.constant dense<0.000000e+00> : vector<8x8xf32>
    %102 = tpu.matmul %100, %101, %cst_27 {dimension_numbers = #tpu.dot_dimension_numbers<[1], [0], [0], [1], [0, 0, 1, 1], [], []>} : vector<8x8xbf16>, vector<8x8xbf16>, vector<8x8xf32> -> vector<8x8xf32>
    %103 = tpu.concatenate %45, %64, %83, %102 in 1 : vector<8x8xf32>, vector<8x8xf32>, vector<8x8xf32>, vector<8x8xf32> -> vector<8x32xf32>
    %104 = arith.truncf %103 : vector<8x32xf32> to vector<8x32xbf16>
    %c0_28 = arith.constant 0 : index
    %c0_29 = arith.constant 0 : index
    %105 = vector.load %arg5[%c0_28, %c0_29] : memref<32x32xf32, #tpu.memory_space<vmem>>, vector<32x32xf32>
    %106 = arith.truncf %105 : vector<32x32xf32> to vector<32x32xbf16>
    %cst_30 = arith.constant dense<0.000000e+00> : vector<8x32xf32>
    %107 = tpu.matmul %104, %106, %cst_30 {dimension_numbers = #tpu.dot_dimension_numbers<[1], [0], [0], [1], [0, 0, 1, 1], [], []>} : vector<8x32xbf16>, vector<32x32xbf16>, vector<8x32xf32> -> vector<8x32xf32>
    %c0_31 = arith.constant 0 : index
    %c0_32 = arith.constant 0 : index
    %108 = vector.load %arg6[%c0_31, %c0_32] : memref<1x32xf32, #tpu.memory_space<vmem>>, vector<1x32xf32>
    %109 = vector.broadcast %108 : vector<1x32xf32> to vector<8x32xf32>
    %110 = arith.addf %107, %109 : vector<8x32xf32>
    %111 = arith.addf %1, %110 : vector<8x32xf32>
    %112 = arith.mulf %111, %111 : vector<8x32xf32>
    %cst_33 = arith.constant dense<0.000000e+00> : vector<8xf32>
    %113 = vector.multi_reduction <add>, %112, %cst_33 [1] : vector<8x32xf32> to vector<8xf32>
    %114 = vector.shape_cast %113 : vector<8xf32> to vector<8x1xf32>
    %cst_34 = arith.constant 3.200000e+01 : f32
    %115 = vector.broadcast %cst_34 : f32 to vector<8x1xf32>
    %116 = arith.divf %114, %115 : vector<8x1xf32>
    %cst_35 = arith.constant 1.1920929E-7 : f32
    %117 = vector.broadcast %cst_35 : f32 to vector<8x1xf32>
    %118 = arith.addf %116, %117 : vector<8x1xf32>
    %119 = math.rsqrt %118 : vector<8x1xf32>
    %120 = vector.broadcast %119 : vector<8x1xf32> to vector<8x32xf32>
    %121 = arith.mulf %111, %120 : vector<8x32xf32>
    %c0_36 = arith.constant 0 : index
    %c0_37 = arith.constant 0 : index
    %122 = vector.load %arg7[%c0_36, %c0_37] : memref<1x32xf32, #tpu.memory_space<vmem>>, vector<1x32xf32>
    %123 = vector.broadcast %122 : vector<1x32xf32> to vector<8x32xf32>
    %124 = arith.mulf %121, %123 : vector<8x32xf32>
    %125 = arith.truncf %124 : vector<8x32xf32> to vector<8x32xbf16>
    %c0_38 = arith.constant 0 : index
    %c0_39 = arith.constant 0 : index
    %126 = vector.load %arg8[%c0_38, %c0_39] : memref<32x128xf32, #tpu.memory_space<vmem>>, vector<32x128xf32>
    %127 = arith.truncf %126 : vector<32x128xf32> to vector<32x128xbf16>
    %cst_40 = arith.constant dense<0.000000e+00> : vector<8x128xf32>
    %128 = tpu.matmul %125, %127, %cst_40 {dimension_numbers = #tpu.dot_dimension_numbers<[1], [0], [0], [1], [0, 0, 1, 1], [], []>} : vector<8x32xbf16>, vector<32x128xbf16>, vector<8x128xf32> -> vector<8x128xf32>
    %c0_41 = arith.constant 0 : index
    %c0_42 = arith.constant 0 : index
    %129 = vector.load %arg9[%c0_41, %c0_42] : memref<1x128xf32, #tpu.memory_space<vmem>>, vector<1x128xf32>
    %130 = vector.broadcast %129 : vector<1x128xf32> to vector<8x128xf32>
    %131 = arith.addf %128, %130 : vector<8x128xf32>
    %cst_43 = arith.constant 0.000000e+00 : f32
    %132 = vector.broadcast %cst_43 : f32 to vector<8x128xf32>
    %133 = arith.maximumf %131, %132 : vector<8x128xf32>
    %134 = arith.truncf %133 : vector<8x128xf32> to vector<8x128xbf16>
    %c0_44 = arith.constant 0 : index
    %c0_45 = arith.constant 0 : index
    %135 = vector.load %arg10[%c0_44, %c0_45] : memref<128x32xf32, #tpu.memory_space<vmem>>, vector<128x32xf32>
    %136 = arith.truncf %135 : vector<128x32xf32> to vector<128x32xbf16>
    %cst_46 = arith.constant dense<0.000000e+00> : vector<8x32xf32>
    %137 = tpu.matmul %134, %136, %cst_46 {dimension_numbers = #tpu.dot_dimension_numbers<[1], [0], [0], [1], [0, 0, 1, 1], [], []>} : vector<8x128xbf16>, vector<128x32xbf16>, vector<8x32xf32> -> vector<8x32xf32>
    %c0_47 = arith.constant 0 : index
    %c0_48 = arith.constant 0 : index
    %138 = vector.load %arg11[%c0_47, %c0_48] : memref<1x32xf32, #tpu.memory_space<vmem>>, vector<1x32xf32>
    %139 = vector.broadcast %138 : vector<1x32xf32> to vector<8x32xf32>
    %140 = arith.addf %137, %139 : vector<8x32xf32>
    %141 = arith.addf %111, %140 : vector<8x32xf32>
    %c0_49 = arith.constant 0 : index
    %c0_50 = arith.constant 0 : index
    %c0_51 = arith.constant 0 : index
    %142 = vector.load %arg12[%c0_49, %c0_50, %c0_51] : memref<1x8x32xf32, #tpu.memory_space<vmem>>, vector<1x8x32xf32>
    %143 = vector.shape_cast %142 : vector<1x8x32xf32> to vector<8x32xf32>
    %144 = vector.shape_cast %141 : vector<8x32xf32> to vector<1x8x32xf32>
    tpu.vector_store %arg12[%c0_49, %c0_50, %c0_51], %144 {strides = array<i32>} : memref<1x8x32xf32, #tpu.memory_space<vmem>>, vector<1x8x32xf32>,
    return
  }
  func.func @transform_0(%arg0: i32) -> (i32, i32, i32) {
    %c0_i32 = arith.constant 0 : i32
    %c0_i32_0 = arith.constant 0 : i32
    %c0_i32_1 = arith.constant 0 : i32
    return %arg0, %c0_i32, %c0_i32_0 : i32, i32, i32
  }
  func.func @transform_1(%arg0: i32) -> (i32, i32) {
    %c0_i32 = arith.constant 0 : i32
    %c0_i32_0 = arith.constant 0 : i32
    %c0_i32_1 = arith.constant 0 : i32
    return %c0_i32, %c0_i32_0 : i32, i32
  }
  func.func @transform_2(%arg0: i32) -> (i32, i32) {
    %c0_i32 = arith.constant 0 : i32
    %c0_i32_0 = arith.constant 0 : i32
    %c0_i32_1 = arith.constant 0 : i32
    return %c0_i32, %c0_i32_0 : i32, i32
  }
  func.func @transform_3(%arg0: i32) -> (i32, i32) {
    %c0_i32 = arith.constant 0 : i32
    %c0_i32_0 = arith.constant 0 : i32
    %c0_i32_1 = arith.constant 0 : i32
    return %c0_i32, %c0_i32_0 : i32, i32
  }
  func.func @transform_4(%arg0: i32) -> (i32, i32) {
    %c0_i32 = arith.constant 0 : i32
    %c0_i32_0 = arith.constant 0 : i32
    %c0_i32_1 = arith.constant 0 : i32
    return %c0_i32, %c0_i32_0 : i32, i32
  }
  func.func @transform_5(%arg0: i32) -> (i32, i32) {
    %c0_i32 = arith.constant 0 : i32
    %c0_i32_0 = arith.constant 0 : i32
    %c0_i32_1 = arith.constant 0 : i32
    return %c0_i32, %c0_i32_0 : i32, i32
  }
  func.func @transform_6(%arg0: i32) -> (i32, i32) {
    %c0_i32 = arith.constant 0 : i32
    %c0_i32_0 = arith.constant 0 : i32
    %c0_i32_1 = arith.constant 0 : i32
    return %c0_i32, %c0_i32_0 : i32, i32
  }
  func.func @transform_7(%arg0: i32) -> (i32, i32) {
    %c0_i32 = arith.constant 0 : i32
    %c0_i32_0 = arith.constant 0 : i32
    %c0_i32_1 = arith.constant 0 : i32
    return %c0_i32, %c0_i32_0 : i32, i32
  }
  func.func @transform_8(%arg0: i32) -> (i32, i32) {
    %c0_i32 = arith.constant 0 : i32
    %c0_i32_0 = arith.constant 0 : i32
    %c0_i32_1 = arith.constant 0 : i32
    return %c0_i32, %c0_i32_0 : i32, i32
  }
  func.func @transform_9(%arg0: i32) -> (i32, i32) {
    %c0_i32 = arith.constant 0 : i32
    %c0_i32_0 = arith.constant 0 : i32
    %c0_i32_1 = arith.constant 0 : i32
    return %c0_i32, %c0_i32_0 : i32, i32
  }
  func.func @transform_10(%arg0: i32) -> (i32, i32) {
    %c0_i32 = arith.constant 0 : i32
    %c0_i32_0 = arith.constant 0 : i32
    %c0_i32_1 = arith.constant 0 : i32
    return %c0_i32, %c0_i32_0 : i32, i32
  }
  func.func @transform_11(%arg0: i32) -> (i32, i32, i32) {
    %c0_i32 = arith.constant 0 : i32
    %c0_i32_0 = arith.constant 0 : i32
    %c0_i32_1 = arith.constant 0 : i32
    return %arg0, %c0_i32, %c0_i32_0 : i32, i32, i32
  }
}

</mosaic_0001>

<bundles_post_ra>
// kernel: tile.23
= control target key start
LH: loop header
LB: loop body
LE: loop exit
PB: predicated region body
PF: predicated region fallthrough
CT: control target
= control target key end

     0   :  { %s22_s0 = inlined_call_operand.vmem [shape: f32[32], index: 0, kind: input, shape index: {}]   ;;  %s23_s1 = inlined_call_operand.vmem [shape: f32[4,32], index: 1, kind: output, shape index: {}]  }
   0x1   :  { %v4_v0 = vld [vmem:[%s22_s0] ss:$0 sm:$0xff] }
   0x2   :  { %5 = vst [vmem:[%s23_s1] sm:$0xf] %v4_v0 }

// kernel: tile.24
= control target key start
LH: loop header
LB: loop body
LE: loop exit
PB: predicated region body
PF: predicated region fallthrough
CT: control target
= control target key end

     0   :  { %vm7_vm0 = vcmask 261120   ;;  %s37_s8 = smov 32   ;;  %s38_s9 = smov 64   ;;  %vm13_vm1 = vcmask 1048320   ;;  %vm19_vm2 = vcmask 785920   ;;  %vm25_vm3 = vcmask 523520   ;;  %s55_s0 = inlined_call_operand.vmem [shape: f32[4,32], index: 0, kind: input, shape index: {}]   ;;  %s56_s1 = inlined_call_operand.vmem [shape: f32[1,128], index: 1, kind: output, shape index: {}]  }
   0x1   :  { %v4_v0 = vld [vmem:[%s55_s0] sm:$0xf]  ;;  %s36_s0 = smov 96  }
   0x2   :  { %5 = vst [vmem:[#allocation1] sm:$0xf] %v4_v0 }
   0x9   :  { %v10_v1 = vld [vmem:[#allocation1 + $0x3] sm:$0x1]   ;;  %v22_v2 = vld [vmem:[#allocation1 + $0x1] sm:$0x1]   ;;  %v6_v3 = vld [vmem:[#allocation1] sm:$0x1]  }
   0xa   :  { %11 = vrot.lane.b32.xlu0 %v10_v1, %s36_s0  ;;  %23 = vrot.lane.b32.xlu1 %v22_v2, %s37_s8  ;;  %v16_v4 = vld [vmem:[#allocation1 + $0x2] sm:$0x1]   ;;  %8 = vst.msk [vmem:[#allocation0] sm:$0x1] %vm7_vm0, %v6_v3  }
   0xe   :  { %17 = vrot.lane.b32.xlu0 %v16_v4, %s38_s9 }
  0x7c   :  { %v12_v5 = vpop.permute.xlu0 %11   ;;  %v24_v6 = vpop.permute.xlu1 %23  }
  0x7d   :  { %14 = vst.msk [vmem:[#allocation0] sm:$0x1] %vm13_vm1, %v12_v5  }
  0x80   :  { %v18_v7 = vpop.permute.xlu0 %17  }
  0x81   :  { %20 = vst.msk [vmem:[#allocation0] sm:$0x1] %vm19_vm2, %v18_v7  }
  0x82   :  { %26 = vst.msk [vmem:[#allocation0] sm:$0x1] %vm25_vm3, %v24_v6  }
  0x89   :  { %v30_v8 = vld [vmem:[#allocation0] sm:$0x1] }
  0x8a   :  { %32 = vst [vmem:[%s56_s1] sm:$0x1] %v30_v8 }

// kernel: transformer_model.10
= control target key start
LH: loop header
LB: loop body
LE: loop exit
PB: predicated region body
PF: predicated region fallthrough
CT: control target
= control target key end

     0   :  { %s82_s0 = inlined_call_operand.vmem [shape: f32[16,128], index: 0, kind: input, shape index: {}]   ;;  %s83_s1 = inlined_call_operand.vmem [shape: f32[1,128], index: 1, kind: input, shape index: {}]   ;;  %s84_s2 = inlined_call_operand.vmem [shape: f32[1,128], index: 2, kind: input, shape index: {}]   ;;  %s85_s3 = inlined_call_operand.vmem [shape: f32[16,128], index: 3, kind: output, shape index: {}]  }
   0x1   :  { %v14_v0 = vld [vmem:[%s82_s0] sm:$0xff]  ;;  %v15_v4 = vld [vmem:[%s82_s0 + $0x8] sm:$0xff] }
   0x2   :  { %v42_v1 = vld [vmem:[%s83_s1] ss:$0 sm:$0xff] }
   0x3   :  { %v43_v2 = vld [vmem:[%s84_s2] ss:$0 sm:$0xff]  ;;  %v23_v3 = vmul.f32 %v42_v1, %v14_v0  ;;  %v24_v5 = vmul.f32 %v42_v1, %v15_v4 }
   0x5   :  { %v32_v6 = vadd.f32 %v43_v2, %v23_v3  ;;  %v33_v7 = vadd.f32 %v43_v2, %v24_v5 }
   0x7   :  { %v34_v8 = vmax.f32 %v32_v6, 0.0  ;;  %v35_v9 = vmax.f32 %v33_v7, 0.0 }
   0x9   :  { %36 = vst [vmem:[%s85_s3] sm:$0xff] %v34_v8  ;;  %37 = vst [vmem:[%s85_s3 + $0x8] sm:$0xff] %v35_v9 }

// kernel: transformer_model.9
= control target key start
LH: loop header
LB: loop body
LE: loop exit
PB: predicated region body
PF: predicated region fallthrough
CT: control target
= control target key end

     0   :  { %s362_s1 = inlined_call_operand.vmem [shape: f32[128,128], index: 1, kind: input, shape index: {}]   ;;  %s363_s0 = inlined_call_operand.vmem [shape: f32[64,128], index: 0, kind: input, shape index: {}]   ;;  %s364_s2 = inlined_call_operand.vmem [shape: f32[1,128], index: 2, kind: input, shape index: {}]   ;;  %s365_s3 = inlined_call_operand.vmem [shape: f32[64,128], index: 3, kind: output, shape index: {}]  }
   0x1   :  { %v47_v0 = vld [vmem:[%s362_s1] sm:$0xff]  ;;  %v48_v1 = vld [vmem:[%s362_s1 + $0x8] sm:$0xff]  ;;  %v49_v2 = vld [vmem:[%s362_s1 + $0x10] sm:$0xff] }
   0x2   :  { %v63_v3 = vpack.c.bf16 %v48_v1, %v47_v0  ;;  %v50_v4 = vld [vmem:[%s362_s1 + $0x18] sm:$0xff]  ;;  %v51_v6 = vld [vmem:[%s362_s1 + $0x20] sm:$0xff]  ;;  %v52_v7 = vld [vmem:[%s362_s1 + $0x28] sm:$0xff] }
   0x3   :  { %v64_v5 = vpack.c.bf16 %v50_v4, %v49_v2  ;;  %v65_v8 = vpack.c.bf16 %v52_v7, %v51_v6  ;;  %v53_v9 = vld [vmem:[%s362_s1 + $0x30] sm:$0xff]  ;;  %v35_v10 = vld [vmem:[%s363_s0] sm:$0xff]  ;;  %v36_v11 = vld [vmem:[%s363_s0 + $0x8] sm:$0xff] }
   0x4   :  { %203 = vmatprep.subr.bf16.mxu0 %v63_v3  ;;  %227 = vmatprep.subr.bf16.mxu1 %v63_v3  ;;  %v54_v12 = vld [vmem:[%s362_s1 + $0x38] sm:$0xff]  ;;  %v43_v13 = vpack.c.bf16 %v36_v11, %v35_v10  ;;  %v39_v14 = vld [vmem:[%s363_s0 + $0x20] sm:$0xff]  ;;  %v40_v15 = vld [vmem:[%s363_s0 + $0x28] sm:$0xff] }
   0x5   :  { %204 = vmatpush3.bf16.msra.mxu0 %v63_v3  ;;  %235 = vmatpush3.bf16.msra.mxu1 %v63_v3  ;;  %v45_v16 = vpack.c.bf16 %v40_v15, %v39_v14  ;;  %v66_v17 = vpack.c.bf16 %v54_v12, %v53_v9  ;;  %v55_v18 = vld [vmem:[%s362_s1 + $0x40] sm:$0xff]  ;;  %v56_v19 = vld [vmem:[%s362_s1 + $0x48] sm:$0xff]  ;;  %v57_v21 = vld [vmem:[%s362_s1 + $0x50] sm:$0xff] }
   0x6   :  { %205 = vmatprep.subr.bf16.mxu0 %v64_v5  ;;  %228 = vmatprep.subr.bf16.mxu1 %v64_v5  ;;  %v67_v20 = vpack.c.bf16 %v56_v19, %v55_v18  ;;  %v58_v22 = vld [vmem:[%s362_s1 + $0x58] sm:$0xff]  ;;  %v59_v24 = vld [vmem:[%s362_s1 + $0x60] sm:$0xff]  ;;  %v60_v25 = vld [vmem:[%s362_s1 + $0x68] sm:$0xff] }
   0x7   :  { %219 = vmatprep.mubr.bf16.mxu0 %v43_v13  ;;  %223 = vmatprep.mubr.bf16.mxu1 %v45_v16  ;;  %v68_v23 = vpack.c.bf16 %v58_v22, %v57_v21  ;;  %v69_v26 = vpack.c.bf16 %v60_v25, %v59_v24  ;;  %v61_v27 = vld [vmem:[%s362_s1 + $0x70] sm:$0xff]  ;;  %v62_v28 = vld [vmem:[%s362_s1 + $0x78] sm:$0xff]  ;;  %v190_v36 = vld [vmem:[%s364_s2] ss:$0 sm:$0xff] }
   0x8   :  { %v70_v29 = vpack.c.bf16 %v62_v28, %v61_v27  ;;  %v37_v30 = vld [vmem:[%s363_s0 + $0x10] sm:$0xff]  ;;  %v38_v31 = vld [vmem:[%s363_s0 + $0x18] sm:$0xff] }
   0x9   :  { %206 = vmatpush3.bf16.msra.mxu0 %v64_v5  ;;  %236 = vmatpush3.bf16.msra.mxu1 %v64_v5  ;;  %v41_v32 = vld [vmem:[%s363_s0 + $0x30] sm:$0xff]  ;;  %v42_v33 = vld [vmem:[%s363_s0 + $0x38] sm:$0xff]  ;;  %v44_v34 = vpack.c.bf16 %v38_v31, %v37_v30 }
   0xa   :  { %207 = vmatprep.subr.bf16.mxu0 %v65_v8  ;;  %229 = vmatprep.subr.bf16.mxu1 %v65_v8  ;;  %v46_v35 = vpack.c.bf16 %v42_v33, %v41_v32 }
   0xd   :  { %208 = vmatpush3.bf16.msra.mxu0 %v65_v8  ;;  %237 = vmatpush3.bf16.msra.mxu1 %v65_v8 }
   0xe   :  { %209 = vmatprep.subr.bf16.mxu0 %v66_v17  ;;  %230 = vmatprep.subr.bf16.mxu1 %v66_v17 }
  0x11   :  { %210 = vmatpush3.bf16.msra.mxu0 %v66_v17  ;;  %238 = vmatpush3.bf16.msra.mxu1 %v66_v17 }
  0x12   :  { %211 = vmatprep.subr.bf16.mxu0 %v67_v20  ;;  %231 = vmatprep.subr.bf16.mxu1 %v67_v20 }
  0x15   :  { %212 = vmatpush3.bf16.msra.mxu0 %v67_v20  ;;  %239 = vmatpush3.bf16.msra.mxu1 %v67_v20 }
  0x16   :  { %213 = vmatprep.subr.bf16.mxu0 %v68_v23  ;;  %232 = vmatprep.subr.bf16.mxu1 %v68_v23 }
  0x19   :  { %214 = vmatpush3.bf16.msra.mxu0 %v68_v23  ;;  %240 = vmatpush3.bf16.msra.mxu1 %v68_v23 }
  0x1a   :  { %215 = vmatprep.subr.bf16.mxu0 %v69_v26  ;;  %233 = vmatprep.subr.bf16.mxu1 %v69_v26 }
  0x1d   :  { %216 = vmatpush3.bf16.msra.mxu0 %v69_v26  ;;  %241 = vmatpush3.bf16.msra.mxu1 %v69_v26 }
  0x1e   :  { %217 = vmatprep.subr.bf16.mxu0 %v70_v29  ;;  %234 = vmatprep.subr.bf16.mxu1 %v70_v29 }
  0x21   :  { %218 = vmatpush3.bf16.msra.mxu0 %v70_v29  ;;  %242 = vmatpush3.bf16.msra.mxu1 %v70_v29 }
  0x24   :  { %220 = vmatmul.mubr.bf16.vlgmr.msra.gmra.mrb[0].mxu0 %v44_v34  ;;  %224 = vmatmul.mubr.bf16.vlgmr.msra.gmra.mrb[0].mxu1 %v46_v35 }
  0xf7   :  { %v221_v37 = vpop.f32.mrb[0].mxu0  ;;  %v225_v38 = vpop.f32.mrb[0].mxu1 }
  0xf8   :  { %v172_v39 = vadd.f32 %v221_v37, %v190_v36  ;;  %v176_v40 = vadd.f32 %v225_v38, %v190_v36  ;;  %v105_v41 = vpop.f32.mrb[1].mxu0  ;;  %v121_v42 = vpop.f32.mrb[1].mxu1 }
  0xf9   :  { %v170_v43 = vadd.f32 %v190_v36, %v105_v41  ;;  %v174_v44 = vadd.f32 %v190_v36, %v121_v42  ;;  %v222_v45 = vpop.f32.mrb[2].mxu0  ;;  %v226_v46 = vpop.f32.mrb[2].mxu1 }
  0xfa   :  { %180 = vst [vmem:[%s365_s3 + $0x10] sm:$0xff] %v172_v39  ;;  %184 = vst [vmem:[%s365_s3 + $0x30] sm:$0xff] %v176_v40  ;;  %v173_v47 = vadd.f32 %v222_v45, %v190_v36  ;;  %v177_v48 = vadd.f32 %v226_v46, %v190_v36  ;;  %v108_v49 = vpop.f32.mrb[3].mxu0  ;;  %v124_v50 = vpop.f32.mrb[3].mxu1 }
  0xfb   :  { %178 = vst [vmem:[%s365_s3] sm:$0xff] %v170_v43  ;;  %182 = vst [vmem:[%s365_s3 + $0x20] sm:$0xff] %v174_v44  ;;  %v171_v51 = vadd.f32 %v190_v36, %v108_v49  ;;  %v175_v52 = vadd.f32 %v190_v36, %v124_v50 }
  0xfc   :  { %181 = vst [vmem:[%s365_s3 + $0x18] sm:$0xff] %v173_v47  ;;  %185 = vst [vmem:[%s365_s3 + $0x38] sm:$0xff] %v177_v48 }
  0xfd   :  { %179 = vst [vmem:[%s365_s3 + $0x8] sm:$0xff] %v171_v51  ;;  %183 = vst [vmem:[%s365_s3 + $0x28] sm:$0xff] %v175_v52 }

// kernel: transformer_model.11
= control target key start
LH: loop header
LB: loop body
LE: loop exit
PB: predicated region body
PF: predicated region fallthrough
CT: control target
= control target key end

     0   :  { %s370_s1 = inlined_call_operand.vmem [shape: f32[256,128], index: 1, kind: input, shape index: {}]   ;;  %s371_s0 = inlined_call_operand.vmem [shape: f32[32,256], index: 0, kind: input, shape index: {}]   ;;  %s372_s2 = inlined_call_operand.vmem [shape: f32[1,128], index: 2, kind: input, shape index: {}]   ;;  %s373_s3 = inlined_call_operand.vmem [shape: f32[32,128], index: 3, kind: output, shape index: {}]  }
   0x1   :  { %v55_v0 = vld [vmem:[%s370_s1 + $0x80] sm:$0xff]  ;;  %v56_v1 = vld [vmem:[%s370_s1 + $0x88] sm:$0xff]  ;;  %v57_v5 = vld [vmem:[%s370_s1 + $0x90] sm:$0xff] }
   0x2   :  { %v39_v2 = vld [vmem:[%s370_s1] sm:$0xff]  ;;  %v79_v3 = vpack.c.bf16 %v56_v1, %v55_v0  ;;  %v40_v4 = vld [vmem:[%s370_s1 + $0x8] sm:$0xff]  ;;  %v58_v6 = vld [vmem:[%s370_s1 + $0x98] sm:$0xff] }
   0x3   :  { %v71_v7 = vpack.c.bf16 %v40_v4, %v39_v2  ;;  %v80_v8 = vpack.c.bf16 %v58_v6, %v57_v5  ;;  %v41_v9 = vld [vmem:[%s370_s1 + $0x10] sm:$0xff]  ;;  %v42_v10 = vld [vmem:[%s370_s1 + $0x18] sm:$0xff]  ;;  %v59_v11 = vld [vmem:[%s370_s1 + $0xa0] sm:$0xff] }
   0x4   :  { %171 = vmatprep.subr.bf16.mxu0 %v79_v3  ;;  %199 = vmatprep.subr.bf16.mxu1 %v79_v3  ;;  %v60_v12 = vld [vmem:[%s370_s1 + $0xa8] sm:$0xff]  ;;  %v72_v13 = vpack.c.bf16 %v42_v10, %v41_v9  ;;  %v43_v15 = vld [vmem:[%s370_s1 + $0x20] sm:$0xff]  ;;  %v61_v17 = vld [vmem:[%s370_s1 + $0xb0] sm:$0xff] }
   0x5   :  { %172 = vmatpush3.bf16.msra.mxu0 %v71_v7  ;;  %207 = vmatpush3.bf16.msra.mxu1 %v71_v7  ;;  %v81_v14 = vpack.c.bf16 %v60_v12, %v59_v11  ;;  %v44_v16 = vld [vmem:[%s370_s1 + $0x28] sm:$0xff]  ;;  %v62_v18 = vld [vmem:[%s370_s1 + $0xb8] sm:$0xff]  ;;  %v45_v21 = vld [vmem:[%s370_s1 + $0x30] sm:$0xff] }
   0x6   :  { %173 = vmatprep.subr.bf16.mxu0 %v80_v8  ;;  %200 = vmatprep.subr.bf16.mxu1 %v80_v8  ;;  %v73_v19 = vpack.c.bf16 %v44_v16, %v43_v15  ;;  %v82_v20 = vpack.c.bf16 %v62_v18, %v61_v17  ;;  %v46_v22 = vld [vmem:[%s370_s1 + $0x38] sm:$0xff]  ;;  %v63_v23 = vld [vmem:[%s370_s1 + $0xc0] sm:$0xff]  ;;  %v64_v24 = vld [vmem:[%s370_s1 + $0xc8] sm:$0xff] }
   0x7   :  { %v28_v25 = vld [vmem:[%s371_s0 + $0x8] sm:$0xff]  ;;  %v30_v26 = vld [vmem:[%s371_s0 + $0x18] sm:$0xff]  ;;  %v74_v29 = vpack.c.bf16 %v46_v22, %v45_v21  ;;  %v83_v32 = vpack.c.bf16 %v64_v24, %v63_v23  ;;  %v47_v33 = vld [vmem:[%s370_s1 + $0x40] sm:$0xff] }
   0x8   :  { %v32_v27 = vld [vmem:[%s371_s0 + $0x28] sm:$0xff]  ;;  %v34_v28 = vld [vmem:[%s371_s0 + $0x38] sm:$0xff]  ;;  %v36_v30 = vpack.c.bf16 %v30_v26, %v28_v25  ;;  %v65_v35 = vld [vmem:[%s370_s1 + $0xd0] sm:$0xff] }
   0x9   :  { %174 = vmatpush3.bf16.msra.mxu0 %v72_v13  ;;  %208 = vmatpush3.bf16.msra.mxu1 %v72_v13  ;;  %v38_v31 = vpack.c.bf16 %v34_v28, %v32_v27  ;;  %v48_v34 = vld [vmem:[%s370_s1 + $0x48] sm:$0xff]  ;;  %v66_v36 = vld [vmem:[%s370_s1 + $0xd8] sm:$0xff]  ;;  %v49_v39 = vld [vmem:[%s370_s1 + $0x50] sm:$0xff] }
   0xa   :  { %175 = vmatprep.subr.bf16.mxu0 %v81_v14  ;;  %201 = vmatprep.subr.bf16.mxu1 %v81_v14  ;;  %v75_v37 = vpack.c.bf16 %v48_v34, %v47_v33  ;;  %v84_v38 = vpack.c.bf16 %v66_v36, %v65_v35  ;;  %v50_v40 = vld [vmem:[%s370_s1 + $0x58] sm:$0xff]  ;;  %v67_v41 = vld [vmem:[%s370_s1 + $0xe0] sm:$0xff]  ;;  %v68_v42 = vld [vmem:[%s370_s1 + $0xe8] sm:$0xff] }
   0xb   :  { %119 = vmatprep.mubr.bf16.mxu0 %v36_v30  ;;  %127 = vmatprep.mubr.bf16.mxu1 %v38_v31  ;;  %v76_v43 = vpack.c.bf16 %v50_v40, %v49_v39  ;;  %v85_v44 = vpack.c.bf16 %v68_v42, %v67_v41  ;;  %v51_v45 = vld [vmem:[%s370_s1 + $0x60] sm:$0xff]  ;;  %v52_v46 = vld [vmem:[%s370_s1 + $0x68] sm:$0xff]  ;;  %v69_v47 = vld [vmem:[%s370_s1 + $0xf0] sm:$0xff] }
   0xc   :  { %v70_v48 = vld [vmem:[%s370_s1 + $0xf8] sm:$0xff]  ;;  %v77_v49 = vpack.c.bf16 %v52_v46, %v51_v45  ;;  %v53_v51 = vld [vmem:[%s370_s1 + $0x70] sm:$0xff]  ;;  %v27_v53 = vld [vmem:[%s371_s0] sm:$0xff] }
   0xd   :  { %176 = vmatpush3.bf16.msra.mxu0 %v73_v19  ;;  %209 = vmatpush3.bf16.msra.mxu1 %v73_v19  ;;  %v86_v50 = vpack.c.bf16 %v70_v48, %v69_v47  ;;  %v54_v52 = vld [vmem:[%s370_s1 + $0x78] sm:$0xff]  ;;  %v29_v55 = vld [vmem:[%s371_s0 + $0x10] sm:$0xff]  ;;  %v31_v56 = vld [vmem:[%s371_s0 + $0x20] sm:$0xff] }
   0xe   :  { %177 = vmatprep.subr.bf16.mxu0 %v82_v20  ;;  %202 = vmatprep.subr.bf16.mxu1 %v82_v20  ;;  %v78_v54 = vpack.c.bf16 %v54_v52, %v53_v51  ;;  %v33_v57 = vld [vmem:[%s371_s0 + $0x30] sm:$0xff]  ;;  %v35_v58 = vpack.c.bf16 %v29_v55, %v27_v53  ;;  %v170_v63 = vld [vmem:[%s372_s2] ss:$0 sm:$0xff] }
   0xf   :  { %v37_v59 = vpack.c.bf16 %v33_v57, %v31_v56 }
  0x11   :  { %178 = vmatpush3.bf16.msra.mxu0 %v74_v29  ;;  %210 = vmatpush3.bf16.msra.mxu1 %v74_v29 }
  0x12   :  { %179 = vmatprep.subr.bf16.mxu0 %v83_v32  ;;  %203 = vmatprep.subr.bf16.mxu1 %v83_v32 }
  0x15   :  { %180 = vmatpush3.bf16.msra.mxu0 %v75_v37  ;;  %211 = vmatpush3.bf16.msra.mxu1 %v75_v37 }
  0x16   :  { %181 = vmatprep.subr.bf16.mxu0 %v84_v38  ;;  %204 = vmatprep.subr.bf16.mxu1 %v84_v38 }
  0x19   :  { %182 = vmatpush3.bf16.msra.mxu0 %v76_v43  ;;  %212 = vmatpush3.bf16.msra.mxu1 %v76_v43 }
  0x1a   :  { %183 = vmatprep.subr.bf16.mxu0 %v85_v44  ;;  %205 = vmatprep.subr.bf16.mxu1 %v85_v44 }
  0x1d   :  { %184 = vmatpush3.bf16.msra.mxu0 %v77_v49  ;;  %213 = vmatpush3.bf16.msra.mxu1 %v77_v49 }
  0x1e   :  { %185 = vmatprep.subr.bf16.mxu0 %v86_v50  ;;  %206 = vmatprep.subr.bf16.mxu1 %v86_v50 }
  0x21   :  { %186 = vmatpush3.bf16.msra.mxu0 %v78_v54  ;;  %214 = vmatpush3.bf16.msra.mxu1 %v78_v54 }
  0x24   :  { %120 = vmatmul.mubr.bf16.vlgmr.msra.gmra.mrb[0].mxu0 %v35_v58  ;;  %128 = vmatmul.mubr.bf16.vlgmr.msra.gmra.mrb[0].mxu1 %v37_v59 }
  0xf7   :  { %v187_v60 = vpop.f32.mrb[0].mxu0  ;;  %v193_v61 = vpop.f32.mrb[0].mxu1 }
  0xf8   :  { %v188_v62 = vpop.f32.mrb[1].mxu0  ;;  %v194_v0 = vpop.f32.mrb[1].mxu1 }
  0xf9   :  { %v189_v1 = vadd.f32 %v188_v62, %v187_v60  ;;  %v195_v2 = vadd.f32 %v194_v0, %v193_v61  ;;  %v190_v3 = vpop.f32.mrb[2].mxu0  ;;  %v196_v4 = vpop.f32.mrb[2].mxu1 }
  0xfa   :  { %v191_v5 = vpop.f32.mrb[3].mxu0  ;;  %v197_v6 = vpop.f32.mrb[3].mxu1 }
  0xfb   :  { %v158_v7 = vadd.f32 %v189_v1, %v170_v63  ;;  %v160_v8 = vadd.f32 %v195_v2, %v170_v63  ;;  %v192_v9 = vadd.f32 %v191_v5, %v190_v3  ;;  %v198_v10 = vadd.f32 %v197_v6, %v196_v4 }
  0xfd   :  { %162 = vst [vmem:[%s373_s3] sm:$0xff] %v158_v7  ;;  %164 = vst [vmem:[%s373_s3 + $0x10] sm:$0xff] %v160_v8  ;;  %v159_v11 = vadd.f32 %v192_v9, %v170_v63  ;;  %v161_v12 = vadd.f32 %v198_v10, %v170_v63 }
  0xff   :  { %163 = vst [vmem:[%s373_s3 + $0x8] sm:$0xff] %v159_v11  ;;  %165 = vst [vmem:[%s373_s3 + $0x18] sm:$0xff] %v161_v12 }

// kernel: transformer_model.12
= control target key start
LH: loop header
LB: loop body
LE: loop exit
PB: predicated region body
PF: predicated region fallthrough
CT: control target
= control target key end

     0   :  { %s71_s0 = inlined_call_operand.vmem [shape: f32[8,128], index: 0, kind: input, shape index: {}]   ;;  %s72_s1 = inlined_call_operand.vmem [shape: f32[1,128], index: 1, kind: input, shape index: {}]   ;;  %s73_s2 = inlined_call_operand.vmem [shape: f32[1,128], index: 2, kind: input, shape index: {}]   ;;  %s74_s3 = inlined_call_operand.vmem [shape: f32[8,128], index: 3, kind: output, shape index: {}]  }
   0x1   :  { %v14_v0 = vld [vmem:[%s71_s0] sm:$0xff] }
   0x2   :  { %v37_v1 = vld [vmem:[%s72_s1] ss:$0 sm:$0xff] }
   0x3   :  { %v38_v2 = vld [vmem:[%s73_s2] ss:$0 sm:$0xff]  ;;  %v22_v3 = vmul.f32 %v37_v1, %v14_v0 }
   0x5   :  { %v30_v4 = vadd.f32 %v38_v2, %v22_v3 }
   0x7   :  { %v31_v5 = vmax.f32 %v30_v4, 0.0 }
   0x9   :  { %32 = vst [vmem:[%s74_s3] sm:$0xff] %v31_v5 }

// kernel: transformer_model.13
= control target key start
LH: loop header
LB: loop body
LE: loop exit
PB: predicated region body
PF: predicated region fallthrough
CT: control target
= control target key end

     0   :  { %v147_v0 = vmov 0.0   ;;  %vm148_vm0 = vmmov 0   ;;  %s232_s1 = inlined_call_operand.vmem [shape: f32[128,128], index: 1, kind: input, shape index: {}]   ;;  %s233_s0 = inlined_call_operand.vmem [shape: f32[16,128], index: 0, kind: input, shape index: {}]   ;;  %s234_s2 = inlined_call_operand.vmem [shape: f32[1,128], index: 2, kind: input, shape index: {}]   ;;  %s235_s3 = inlined_call_operand.vmem [shape: f32[16,128], index: 3, kind: output, shape index: {}]  }
   0x1   :  { %125 = vmatprep.subr.bf16.mxu0 %v147_v0  ;;  %v26_v1 = vld [vmem:[%s232_s1] sm:$0xff]  ;;  %v27_v2 = vld [vmem:[%s232_s1 + $0x8] sm:$0xff]  ;;  %v28_v3 = vld [vmem:[%s232_s1 + $0x10] sm:$0xff]  ;;  %141 = vmatprep.mubr.msk.bf16.mxu0 %vm148_vm0, %v147_v0 }
   0x2   :  { %v42_v4 = vpack.c.bf16 %v27_v2, %v26_v1  ;;  %v29_v5 = vld [vmem:[%s232_s1 + $0x18] sm:$0xff]  ;;  %v30_v7 = vld [vmem:[%s232_s1 + $0x20] sm:$0xff]  ;;  %v31_v8 = vld [vmem:[%s232_s1 + $0x28] sm:$0xff] }
   0x3   :  { %v43_v6 = vpack.c.bf16 %v29_v5, %v28_v3  ;;  %v44_v9 = vpack.c.bf16 %v31_v8, %v30_v7  ;;  %v32_v10 = vld [vmem:[%s232_s1 + $0x30] sm:$0xff]  ;;  %v33_v11 = vld [vmem:[%s232_s1 + $0x38] sm:$0xff]  ;;  %v34_v13 = vld [vmem:[%s232_s1 + $0x40] sm:$0xff] }
   0x4   :  { %126 = vmatpush3.bf16.msra.mxu0 %v42_v4  ;;  %v45_v12 = vpack.c.bf16 %v33_v11, %v32_v10  ;;  %v35_v14 = vld [vmem:[%s232_s1 + $0x48] sm:$0xff]  ;;  %v36_v16 = vld [vmem:[%s232_s1 + $0x50] sm:$0xff]  ;;  %v37_v17 = vld [vmem:[%s232_s1 + $0x58] sm:$0xff] }
   0x5   :  { %127 = vmatprep.subr.bf16.mxu0 %v147_v0  ;;  %v46_v15 = vpack.c.bf16 %v35_v14, %v34_v13  ;;  %v47_v18 = vpack.c.bf16 %v37_v17, %v36_v16  ;;  %v38_v19 = vld [vmem:[%s232_s1 + $0x60] sm:$0xff]  ;;  %v39_v20 = vld [vmem:[%s232_s1 + $0x68] sm:$0xff]  ;;  %v40_v22 = vld [vmem:[%s232_s1 + $0x70] sm:$0xff] }
   0x6   :  { %v48_v21 = vpack.c.bf16 %v39_v20, %v38_v19  ;;  %v41_v23 = vld [vmem:[%s232_s1 + $0x78] sm:$0xff]  ;;  %v23_v25 = vld [vmem:[%s233_s0] sm:$0xff]  ;;  %v24_v26 = vld [vmem:[%s233_s0 + $0x8] sm:$0xff] }
   0x7   :  { %v49_v24 = vpack.c.bf16 %v41_v23, %v40_v22  ;;  %v25_v27 = vpack.c.bf16 %v24_v26, %v23_v25  ;;  %v115_v28 = vld [vmem:[%s234_s2] ss:$0 sm:$0xff] }
   0x8   :  { %128 = vmatpush3.bf16.msra.mxu0 %v43_v6 }
   0x9   :  { %129 = vmatprep.subr.bf16.mxu0 %v147_v0 }
   0xc   :  { %130 = vmatpush3.bf16.msra.mxu0 %v44_v9 }
   0xd   :  { %131 = vmatprep.subr.bf16.mxu0 %v147_v0 }
  0x10   :  { %132 = vmatpush3.bf16.msra.mxu0 %v45_v12 }
  0x11   :  { %133 = vmatprep.subr.bf16.mxu0 %v147_v0 }
  0x14   :  { %134 = vmatpush3.bf16.msra.mxu0 %v46_v15 }
  0x15   :  { %135 = vmatprep.subr.bf16.mxu0 %v147_v0 }
  0x18   :  { %136 = vmatpush3.bf16.msra.mxu0 %v47_v18 }
  0x19   :  { %137 = vmatprep.subr.bf16.mxu0 %v147_v0 }
  0x1c   :  { %138 = vmatpush3.bf16.msra.mxu0 %v48_v21 }
  0x1d   :  { %139 = vmatprep.subr.bf16.mxu0 %v147_v0 }
  0x20   :  { %140 = vmatpush3.bf16.msra.mxu0 %v49_v24 }
  0x23   :  { %142 = vmatmul.mubr.bf16.vlgmr.msra.gmra.mrb[0].mxu0 %v25_v27 }
  0xf6   :  { %v84_v29 = vpop.f32.mrb[0].mxu0 }
  0xf7   :  { %v107_v30 = vadd.f32 %v115_v28, %v84_v29  ;;  %v143_v31 = vpop.f32.mrb[1].mxu0 }
  0xf8   :  { %v87_v32 = vpop.f32.mrb[2].mxu0 }
  0xf9   :  { %109 = vst [vmem:[%s235_s3] sm:$0xff] %v107_v30  ;;  %v108_v33 = vadd.f32 %v115_v28, %v87_v32  ;;  %v144_v34 = vpop.f32.mrb[3].mxu0 }
  0xfb   :  { %110 = vst [vmem:[%s235_s3 + $0x8] sm:$0xff] %v108_v33 }

// kernel: transformer_model.17
= control target key start
LH: loop header
LB: loop body
LE: loop exit
PB: predicated region body
PF: predicated region fallthrough
CT: control target
= control target key end

     0   :  { %vm16_vm0 = vcmask 261120   ;;  %s134_s0 = inlined_call_operand.vmem [shape: f32[16,32], index: 0, kind: input, shape index: {}]   ;;  %s135_s1 = inlined_call_operand.vmem [shape: f32[1,32], index: 1, kind: input, shape index: {}]   ;;  %s136_s2 = inlined_call_operand.hbm [shape: f32[16,32], index: 2, kind: output, shape index: {}]  }
   0x1   :  { %v12_v0 = vld [vmem:[%s134_s0] sm:$0xff]  ;;  %v13_v1 = vld [vmem:[%s134_s0 + $0x8] sm:$0xff] }
   0x2   :  { %7 = vsyncpa [#allocation3], 0  ;;  %v14_v2 = vmul.f32 %v12_v0, %v12_v0  ;;  %v15_v3 = vmul.f32 %v13_v1, %v13_v1  ;;  %v59_v13 = vld [vmem:[%s135_s1] ss:$0 sm:$0xff]  ;;  %s91_s14 = smov [#allocation2]  }
   0x3   :  { %s48_s15 = sshll.u32 %s91_s14, 4  ;;  %s49_s15 = int_to_ptr.vmem [resolvable:$true] %s48_s15 }
   0x4   :  { %v17_v4 = vsel %vm16_vm0, %v14_v2, 0.0  ;;  %v20_v5 = vsel %vm16_vm0, %v15_v3, 0.0  ;;  %s67_s16 = scalar_lea.vmem %s49_s15, 256  ;;  %p72_p1 = scmp.lt.s32.totalorder %s49_s15, %s49_s15 }
   0x5   :  { %18 = vadd.xlane.f32.xlu0 %v17_v4  ;;  %p68_p0 = scmp.ne.s32.totalorder %s49_s15, %s67_s16  ;;  %p73_p2 = scmp.lt.s32.totalorder %s67_s16, %s67_s16 }
   0x7   :  { %p74_p3 = por %p73_p2, %p72_p1 }
   0x9   :  { %21 = vadd.xlane.f32.xlu0 %v20_v5  ;;  %p75_p4 = pnand %p74_p3, %p68_p0 }
  0x92   :  { %v19_v6 = vpop.xlane.xlu0 %18 }
  0x93   :  { %v24_v7 = vmul.f32 0.03125, %v19_v6 }
  0x95   :  { %v26_v8 = vadd.f32 1.1920929e-07, %v24_v7 }
  0x96   :  { %v22_v9 = vpop.xlane.xlu0 %21 }
  0x97   :  { %63 = vrsqrt.f32 %v26_v8  ;;  %v25_v10 = vmul.f32 0.03125, %v22_v9 }
  0x99   :  { %v27_v11 = vadd.f32 1.1920929e-07, %v25_v10 }
  0x9b   :  { %65 = vrsqrt.f32 %v27_v11 }
  0xa1   :  { %v64_v12 = vpop.eup %63 }
  0xa2   :  { %v30_v14 = vmul.f32 %v64_v12, %v12_v0 }
  0xa4   :  { %v39_v15 = vmul.f32 %v59_v13, %v30_v14 }
  0xa5   :  { %v66_v16 = vpop.eup %65 }
  0xa6   :  { %v31_v17 = vmul.f32 %v66_v16, %v13_v1  ;;  %41 = vst.msk [vmem:[#allocation2] sm:$0xff] %vm16_vm0, %v39_v15 }
  0xa8   :  { %v40_v18 = vmul.f32 %v59_v13, %v31_v17 }
  0xaa   :  { %42 = vst.msk [vmem:[#allocation2 + $0x8] sm:$0xff] %vm16_vm0, %v40_v18 }
  0xab   :  { %78 = shalt.err (!%p75_p4)
}
  0xac   :  { %s79_s18 = scalar_lea.hbm %s136_s2, 256 }
  0xad   :  { %p80_p5 = scmp.ne.s32.totalorder %s136_s2, %s79_s18  ;;  %p83_p6 = scmp.lt.u32.totalorder %s79_s18, %s136_s2 }
  0xaf   :  { %p85_p7 = pnand %p83_p6, %p80_p5 }
  0xb1   :  { %88 = shalt.err (!%p85_p7)
}
  0xb2   :  { %s92_s23 = smov 128   ;;  %s93_s24 = smov 8  }
  0xb3   :  { %54 = dma.vmem_to_hbm [thread:$0]  %s49_s15, 256, %s136_s2, [#allocation3], %s92_s23, %s92_s23, %s93_s24  }
  0xb4   :  { %89 = dma.done.wait [#allocation3], 256  }
  0xb5   :  { %90 = vsyncadd [#allocation3], 4294967040 }
  0xb6   :  { %58 = vsyncpa [#allocation3], 1 }

// kernel: transformer_model.14
= control target key start
LH: loop header
LB: loop body
LE: loop exit
PB: predicated region body
PF: predicated region fallthrough
CT: control target
= control target key end

     0   :  { %s1460_s17 = smov 0   ;;  %s1685_s0 = inlined_call_operand.vmem [shape: f32[2,8,32], index: 0, kind: input, shape index: {}]   ;;  %s1686_s1 = inlined_call_operand.vmem [shape: f32[1,32], index: 1, kind: input, shape index: {}]   ;;  %s1687_s2 = inlined_call_operand.vmem [shape: f32[32,96], index: 2, kind: input, shape index: {}]   ;;  %s1688_s3 = inlined_call_operand.vmem [shape: f32[1,96], index: 3, kind: input, shape index: {}]   ;;  %s1689_s4 = inlined_call_operand.vmem [shape: f32[32,32], index: 4, kind: input, shape index: {}]   ;;  %s1690_s5 = inlined_call_operand.vmem [shape: f32[1,32], index: 5, kind: input, shape index: {}]   ;;  %s1691_s6 = inlined_call_operand.vmem [shape: f32[1,32], index: 6, kind: input, shape index: {}]   ;;  %s1692_s7 = inlined_call_operand.vmem [shape: f32[32,128], index: 7, kind: input, shape index: {}]   ;;  %s1693_s8 = inlined_call_operand.vmem [shape: f32[1,128], index: 8, kind: input, shape index: {}]   ;;  %s1694_s9 = inlined_call_operand.vmem [shape: f32[128,32], index: 9, kind: input, shape index: {}]   ;;  %s1695_s10 = inlined_call_operand.vmem [shape: f32[1,32], index: 10, kind: input, shape index: {}]   ;;  %s1696_s11 = inlined_call_operand.vmem [shape: f32[2,8,32], index: 11, kind: output, shape index: {}]  }
   0x1 LB: > { %s1180_s18 = sadd.s32 4294967295, %s1382_s17   ;;  %p1184_p0 = scmp.ge.s32.totalorder %s1382_s17, 1  ;;  %s1382_s17 = sphi %s1460_s17, %s21_s17  }
   0x2   : > { %p336_p1 = scmp.lt.s32.totalorder %s1382_s17, 3 }
   0x4   : > { %p337_p2 = pnand %p1184_p0, %p336_p1 }
   0x5   : > { %p374_p3 = scmp.lt.s32.totalorder (!%p337_p2), %s1180_s18, 1  ;;  %vm385_vm0 = vcmask (!%p337_p2), 261120   ;;  %v403_v3 = vld [vmem:[%s1687_s2] sm:$0xff] (!%p337_p2)  ;;  %v404_v4 = vld [vmem:[%s1687_s2 + $0x8] sm:$0xff] (!%p337_p2)  ;;  %v405_v5 = vld [vmem:[%s1687_s2 + $0x10] sm:$0xff] (!%p337_p2)  ;;  %v1384_v6 = vmov (!%p337_p2), 0.0  }
   0x6   : > { %340 = sbr.rel (%p337_p2) target bundleno = 2251 (0x8cb), region = 64  ;;  %1240 = vmatprep.subr.bf16.mxu0 (!%p337_p2), %v1384_v6  ;;  %v407_v7 = vpack.c.bf16 (!%p337_p2), %v404_v4, %v403_v3  ;;  %v406_v8 = vld [vmem:[%s1687_s2 + $0x18] sm:$0xff] (!%p337_p2)  ;;  %vm1385_vm1 = vmmov (!%p337_p2), 0   ;;  %1260 = vmatprep.subr.bf16.mxu1 (!%p337_p2), %v1384_v6  ;;  %v1187_v14 = vld [vmem:[%s1686_s1] ss:$0 sm:$0xff] (!%p337_p2)  ;;  %s1386_s16 = smov (!%p337_p2), 88  }
   0x7   : > { %1244 = vmatprep.mubr.msk.bf16.mxu0 (!%p337_p2), %vm1385_vm1, %v1384_v6  ;;  %1262 = vmatprep.mubr.msk.bf16.mxu1 (!%p337_p2), %vm1385_vm1, %v1384_v6  ;;  %v408_v9 = vpack.c.bf16 (!%p337_p2), %v406_v8, %v405_v5  ;;  %v1188_v18 = vld [vmem:[%s1688_s3] ss:$0 sm:$0xff] (!%p337_p2)  ;;  %s1387_s20 = smov (!%p337_p2), 96   ;;  %s1388_s21 = smov (!%p337_p2), 80   ;;  %vm465_vm2 = vcmask (!%p337_p2), 64512   ;;  %vm529_vm3 = vcmask (!%p337_p2), 1043456  }
   0x8   : > { %1241 = vmatpush3.bf16.msra.mxu0 (!%p337_p2), %v407_v7  ;;  %s1390_s23 = smov (!%p337_p2), 112   ;;  %s1391_s24 = smov (!%p337_p2), 72   ;;  %vm917_vm4 = vcmask (!%p337_p2), 130048   ;;  %vm919_vm5 = vcmask (!%p337_p2), 195584  }
   0x9   : > { %1242 = vmatprep.subr.bf16.mxu0 (!%p337_p2), %v1384_v6  ;;  %s1392_s25 = smov (!%p337_p2), 104   ;;  %s1393_s26 = smov (!%p337_p2), 56  }
   0xa   : > { %s1394_s27 = smov (!%p337_p2), 64   ;;  %s1395_s28 = smov (!%p337_p2), 40  }
   0xb   : > { %s1396_s29 = smov (!%p337_p2), 48   ;;  %s1397_s30 = smov (!%p337_p2), 8  }
   0xc   : > { %1243 = vmatpush3.bf16.msra.mxu0 (!%p337_p2), %v408_v9 }
   0xd   : > { %s1698_s18 = smov (!%p374_p3, %s1180_s18), 1  ;;  %1248 = vmatprep.subr.bf16.mxu0 %v1384_v6 }
   0xe   : > { %s1185_s19 = sshll.u32 %s1698_s18, 3 }
   0xf   : > { %s377_s22 = scalar_lea.vmem %s1685_s0, %s1185_s19 }
  0x10   : > { %v1476_v0 = vld [vmem:[%s377_s22] sm:$0xff]  ;;  %s1389_s22 = smov 120  }
  0x11   : > { %v384_v1 = vmul.f32 %v1476_v0, %v1476_v0 }
  0x13   : > { %v386_v2 = vsel %vm385_vm0, %v384_v1, 0.0 }
  0x14   : > { %387 = vadd.xlane.f32.xlu0 %v386_v2 }
  0xa1   : > { %v388_v10 = vpop.xlane.xlu0 %387 }
  0xa2   : > { %v390_v11 = vmul.f32 0.03125, %v388_v10 }
  0xa4   : > { %v391_v12 = vadd.f32 1.1920929e-07, %v390_v11 }
  0xa6   : > { %1356 = vrsqrt.f32 %v391_v12 }
  0xb0   : > { %v1357_v13 = vpop.eup %1356 }
  0xb1   : > { %v393_v15 = vmul.f32 %v1357_v13, %v1476_v0 }
  0xb3   : > { %v401_v16 = vmul.f32 %v1187_v14, %v393_v15 }
  0xb5   : > { %v402_v17 = vpack.c.bf16 %v401_v16, %v401_v16 }
  0xb7   : > { %1245 = vmatmul.mubr.msk.bf16.vlgmr.msra.gmra.mrb[0].mxu0 %vm385_vm0, %v402_v17 }
  0xb8   : > { %1250 = vmatprep.mubr.msk.bf16.mxu0 %vm1385_vm1, %v1384_v6 }
 0x18a   : > { %v453_v19 = vpop.f32.mrb[0].mxu0 }
 0x18b   : > { %v454_v20 = vadd.f32 %v1188_v18, %v453_v19  ;;  %v1246_v21 = vpop.f32.mrb[1].mxu0 }
 0x18c   : > { %v456_v22 = vpop.f32.mrb[2].mxu0 }
 0x18d   : > { %v1511_v23 = vpack.c.bf16 %v454_v20, %v454_v20  ;;  %v1247_v24 = vpop.f32.mrb[3].mxu0  ;;  %v459_v25 = vmul.f32 0.35355338, %v454_v20 }
 0x18f   : > { %576 = vrot.lane.b32.xlu1 %v1511_v23, %s1386_s16  ;;  %463 = vrot.lane.b32.xlu0 %v1511_v23, %s1387_s20  ;;  %v460_v26 = vpack.c.bf16 %v459_v25, %v459_v25 }
 0x193   : > { %686 = vrot.lane.b32.xlu1 %v1511_v23, %s1388_s21 }
 0x197   : > { %574 = vrot.lane.b32.xlu1 %v460_v26, %s1389_s22 }
 0x19b   : > { %684 = vrot.lane.b32.xlu1 %v460_v26, %s1390_s23  ;;  %s1398_s23 = smov 16  }
 0x19f   : > { %796 = vrot.lane.b32.xlu1 %v1511_v23, %s1391_s24  ;;  %s1399_s24 = smov 24  }
 0x1a3   : > { %794 = vrot.lane.b32.xlu1 %v460_v26, %s1392_s25 }
 0x201   : > { %v577_v27 = vpop.permute.xlu1 %576  ;;  %v464_v28 = vpop.permute.xlu0 %463 }
 0x202   : > { %v470_v29 = vsel %vm465_vm2, %v464_v28, 0  ;;  %v582_v30 = vsel %vm465_vm2, %v577_v27, 0 }
 0x203   : > { %1249 = vmatpush3.bf16.xpose.msra.mxu0 %v470_v29  ;;  %1261 = vmatpush3.bf16.xpose.msra.mxu1 %v582_v30 }
 0x204   : > { %1272 = vmatprep.subr.bf16.mxu1 %v1384_v6  ;;  %1254 = vmatprep.subr.bf16.mxu0 %v1384_v6 }
 0x205   : > { %v687_v31 = vpop.permute.xlu1 %686 }
 0x206   : > { %v692_v33 = vsel %vm465_vm2, %v687_v31, 0 }
 0x209   : > { %v575_v32 = vpop.permute.xlu1 %574 }
 0x20a   : > { %1251 = vmatmul.mubr.msk.bf16.vlgmr.msra.gmra.mrb[4].mxu0 %vm465_vm2, %v460_v26  ;;  %1263 = vmatmul.mubr.msk.bf16.vlgmr.msra.gmra.mrb[0].mxu1 %vm465_vm2, %v575_v32 }
 0x20b   : > { %1273 = vmatpush3.bf16.xpose.msra.mxu1 %v692_v33  ;;  %1274 = vmatprep.mubr.msk.bf16.mxu1 %vm1385_vm1, %v1384_v6 }
 0x20c   : > { %1284 = vmatprep.subr.bf16.mxu1 %v1384_v6  ;;  %1256 = vmatprep.mubr.msk.bf16.mxu0 %vm1385_vm1, %v1384_v6 }
 0x20d   : > { %v685_v34 = vpop.permute.xlu1 %684 }
 0x211   : > { %v797_v35 = vpop.permute.xlu1 %796 }
 0x212   : > { %v802_v36 = vsel %vm465_vm2, %v797_v35, 0  ;;  %1275 = vmatmul.mubr.msk.bf16.vlgmr.msra.gmra.mrb[4].mxu1 %vm465_vm2, %v685_v34 }
 0x213   : > { %1285 = vmatpush3.bf16.xpose.msra.mxu1 %v802_v36  ;;  %1286 = vmatprep.mubr.msk.bf16.mxu1 %vm1385_vm1, %v1384_v6 }
 0x214   : > { %1296 = vmatprep.subr.bf16.mxu1 %v1384_v6 }
 0x215   : > { %v795_v37 = vpop.permute.xlu1 %794 }
 0x21a   : > { %1287 = vmatmul.mubr.msk.bf16.vlgmr.msra.gmra.mrb[8].mxu1 %vm465_vm2, %v795_v37 }
 0x21b   : > { %1300 = vmatprep.mubr.msk.bf16.mxu1 %vm1385_vm1, %v1384_v6 }
 0x2dd   : > { %v506_v38 = vpop.f32.mrb[4].mxu0  ;;  %v618_v39 = vpop.f32.mrb[0].mxu1 }
 0x2de   : > { %v1252_v40 = vpop.f32.mrb[5].mxu0  ;;  %v1264_v41 = vpop.f32.mrb[1].mxu1  ;;  %v624_v42 = vsel %vm465_vm2, %v618_v39, -inf  ;;  %v512_v43 = vsel %vm465_vm2, %v506_v38, -inf }
 0x2df   : > { %625 = vmax.xlane.f32.xlu0 %v624_v42  ;;  %v621_v44 = vpop.f32.mrb[2].mxu1  ;;  %513 = vmax.xlane.f32.xlu1 %v512_v43  ;;  %v509_v45 = vpop.f32.mrb[6].mxu0 }
 0x2e0   : > { %v1253_v46 = vpop.f32.mrb[7].mxu0  ;;  %v1265_v47 = vpop.f32.mrb[3].mxu1 }
 0x2e5   : > { %v728_v48 = vpop.f32.mrb[4].mxu1 }
 0x2e6   : > { %v1276_v49 = vpop.f32.mrb[5].mxu1  ;;  %v734_v50 = vsel %vm465_vm2, %v728_v48, -inf }
 0x2e7   : > { %735 = vmax.xlane.f32.xlu0 %v734_v50  ;;  %v731_v51 = vpop.f32.mrb[6].mxu1  ;;  %v923_v49 = vld [vmem:[%s1689_s4 + $0x8] sm:$0xff] }
 0x2e8   : > { %v1277_v52 = vpop.f32.mrb[7].mxu1  ;;  %v924_v51 = vld [vmem:[%s1689_s4 + $0x10] sm:$0xff] }
 0x2e9   : > { %v925_v52 = vld [vmem:[%s1689_s4 + $0x18] sm:$0xff] }
 0x2ed   : > { %v838_v53 = vpop.f32.mrb[8].mxu1 }
 0x2ee   : > { %v1288_v54 = vpop.f32.mrb[9].mxu1  ;;  %v844_v55 = vsel %vm465_vm2, %v838_v53, -inf }
 0x2ef   : > { %v841_v56 = vpop.f32.mrb[10].mxu1  ;;  %845 = vmax.xlane.f32.xlu1 %v844_v55 }
 0x2f0   : > { %v1289_v57 = vpop.f32.mrb[11].mxu1 }
 0x36c   : > { %v626_v58 = vpop.xlane.xlu0 %625  ;;  %v514_v59 = vpop.xlane.xlu1 %513 }
 0x36d   : > { %v627_v60 = vsub.f32 %v618_v39, %v626_v58  ;;  %v515_v61 = vsub.f32 %v506_v38, %v514_v59 }
 0x36f   : > { %v628_v62 = vmul.f32 1.442695, %v627_v60  ;;  %v516_v63 = vmul.f32 1.442695, %v515_v61 }
 0x371   : > { %1358 = vpow2.f32 %v628_v62 }
 0x372   : > { %1360 = vpow2.f32 %v516_v63 }
 0x374   : > { %v736_v1 = vpop.xlane.xlu0 %735 }
 0x375   : > { %v737_v2 = vsub.f32 %v728_v48, %v736_v1  ;;  %v922_v48 = vld [vmem:[%s1689_s4] sm:$0xff] }
 0x376   : > { %v926_v50 = vpack.c.bf16 %v923_v49, %v922_v48  ;;  %v1067_v48 = vld [vmem:[%s1694_s9 + $0x68] sm:$0xff] }
 0x377   : > { %v738_v3 = vmul.f32 1.442695, %v737_v2 }
 0x378   : > { %1297 = vmatpush3.bf16.msra.mxu1 %v926_v50  ;;  %v1068_v50 = vld [vmem:[%s1694_s9 + $0x70] sm:$0xff] }
 0x379   : > { %1362 = vpow2.f32 %v738_v3  ;;  %1298 = vmatprep.subr.bf16.mxu1 %v1384_v6 }
 0x37b   : > { %v1359_v4 = vpop.eup %1358 }
 0x37c   : > { %v1361_v5 = vpop.eup %1360  ;;  %v630_v7 = vsel %vm465_vm2, %v1359_v4, 0.0  ;;  %v846_v11 = vpop.xlane.xlu1 %845 }
 0x37d   : > { %631 = vadd.xlane.f32.xlu1 %v630_v7  ;;  %v518_v8 = vsel %vm465_vm2, %v1361_v5, 0.0  ;;  %v847_v12 = vsub.f32 %v838_v53, %v846_v11  ;;  %v927_v53 = vpack.c.bf16 %v925_v52, %v924_v51  ;;  %v1198_v7 = vld [vmem:[%s1690_s5] ss:$0 sm:$0xff]  ;;  %v1069_v51 = vld [vmem:[%s1694_s9 + $0x78] sm:$0xff] }
 0x37e   : > { %519 = vadd.xlane.f32.xlu0 %v518_v8  ;;  %v1077_v52 = vpack.c.bf16 %v1069_v51, %v1068_v50 }
 0x37f   : > { %v848_v13 = vmul.f32 1.442695, %v847_v12  ;;  %1299 = vmatpush3.bf16.msra.mxu1 %v927_v53  ;;  %v1201_v53 = vld [vmem:[%s1693_s8] ss:$0 sm:$0xff] }
 0x380   : > { %1312 = vmatprep.subr.bf16.mxu1 %v1384_v6 }
 0x381   : > { %1364 = vpow2.f32 %v848_v13 }
 0x383   : > { %v1363_v9 = vpop.eup %1362 }
 0x384   : > { %v740_v10 = vsel %vm465_vm2, %v1363_v9, 0.0 }
 0x385   : > { %741 = vadd.xlane.f32.xlu0 %v740_v10 }
 0x38b   : > { %v1365_v14 = vpop.eup %1364 }
 0x38c   : > { %v850_v15 = vsel %vm465_vm2, %v1365_v14, 0.0 }
 0x38e   : > { %636 = vrot.lane.b32.xlu1 %v1511_v23, %s1393_s26 }
 0x39b   : > { %524 = vrot.lane.b32.xlu0 %v1511_v23, %s1394_s27  ;;  %s381_s27 = scalar_lea.vmem %s1696_s11, %s1185_s19 }
 0x39f   : > { %856 = vrot.lane.b32.xlu0 %v1511_v23, %s1395_s28 }
 0x3b2   : > { %851 = vadd.xlane.f32.xlu1 %v850_v15 }
 0x3c3   : > { %746 = vrot.lane.b32.xlu1 %v1511_v23, %s1396_s29 }
 0x40a   : > { %v632_v17 = vpop.xlane.xlu1 %631 }
 0x40b   : > { %v520_v16 = vpop.xlane.xlu0 %519 }
 0x40c   : > { %1366 = vrcp.f32 %v520_v16  ;;  %v996_v16 = vld [vmem:[%s1692_s7] sm:$0xff] }
 0x40d   : > { %1368 = vrcp.f32 %v632_v17  ;;  %v997_v17 = vld [vmem:[%s1692_s7 + $0x8] sm:$0xff] }
 0x40e   : > { %v637_v24 = vpop.permute.xlu1 %636 }
 0x40f   : > { %v642_v27 = vsel %vm529_vm3, %v637_v24, 0  ;;  %v1056_v24 = vld [vmem:[%s1694_s9 + $0x10] sm:$0xff] }
 0x412   : > { %v742_v18 = vpop.xlane.xlu0 %741 }
 0x413   : > { %1370 = vrcp.f32 %v742_v18  ;;  %v1000_v18 = vpack.c.bf16 %v997_v17, %v996_v16 }
 0x416   : > { %v1367_v19 = vpop.eup %1366  ;;  %v525_v20 = vpop.permute.xlu0 %524 }
 0x417   : > { %v522_v21 = vmul.f32 %v1367_v19, %v1361_v5  ;;  %v531_v22 = vsel %vm529_vm3, %v525_v20, 0  ;;  %v1369_v26 = vpop.eup %1368  ;;  %v999_v19 = vld [vmem:[%s1692_s7 + $0x18] sm:$0xff] }
 0x418   : > { %1255 = vmatpush3.bf16.msra.mxu0 %v531_v22  ;;  %v634_v23 = vmul.f32 %v1369_v26, %v1359_v4  ;;  %v1055_v22 = vld [vmem:[%s1694_s9 + $0x8] sm:$0xff]  ;;  %v1057_v26 = vld [vmem:[%s1694_s9 + $0x18] sm:$0xff] }
 0x419   : > { %v523_v25 = vpack.c.bf16 %v522_v21, %v522_v21  ;;  %1266 = vmatprep.subr.bf16.mxu0 %v1384_v6  ;;  %v1054_v21 = vld [vmem:[%s1694_s9] sm:$0xff] }
 0x41a   : > { %v635_v28 = vpack.c.bf16 %v634_v23, %v634_v23  ;;  %v857_v34 = vpop.permute.xlu0 %856  ;;  %v1058_v23 = vld [vmem:[%s1694_s9 + $0x20] sm:$0xff] }
 0x41b   : > { %1257 = vmatmul.mubr.msk.bf16.vlgmr.msra.gmra.mrb[8].mxu0 %vm465_vm2, %v523_v25  ;;  %v862_v36 = vsel %vm529_vm3, %v857_v34, 0  ;;  %v1070_v25 = vpack.c.bf16 %v1055_v22, %v1054_v21  ;;  %v1063_v34 = vld [vmem:[%s1694_s9 + $0x48] sm:$0xff] }
 0x41c   : > { %1267 = vmatpush3.bf16.msra.mxu0 %v642_v27  ;;  %1268 = vmatprep.mubr.msk.bf16.mxu0 %vm1385_vm1, %v1384_v6  ;;  %v1071_v27 = vpack.c.bf16 %v1057_v26, %v1056_v24 }
 0x41d   : > { %1278 = vmatprep.subr.bf16.mxu0 %v1384_v6  ;;  %v1371_v29 = vpop.eup %1370 }
 0x41e   : > { %v744_v31 = vmul.f32 %v1371_v29, %v1363_v9 }
 0x420   : > { %v745_v35 = vpack.c.bf16 %v744_v31, %v744_v31  ;;  %v1061_v31 = vld [vmem:[%s1694_s9 + $0x38] sm:$0xff] }
 0x423   : > { %1269 = vmatmul.mubr.msk.bf16.vlgmr.msra.gmra.mrb[12].mxu0 %vm465_vm2, %v635_v28  ;;  %v1059_v28 = vld [vmem:[%s1694_s9 + $0x28] sm:$0xff] }
 0x424   : > { %1280 = vmatprep.mubr.msk.bf16.mxu0 %vm1385_vm1, %v1384_v6  ;;  %v1072_v29 = vpack.c.bf16 %v1059_v28, %v1058_v23 }
 0x43f   : > { %v852_v30 = vpop.xlane.xlu1 %851 }
 0x440   : > { %1372 = vrcp.f32 %v852_v30  ;;  %v1060_v30 = vld [vmem:[%s1694_s9 + $0x30] sm:$0xff] }
 0x443   : > { %v747_v32 = vpop.permute.xlu1 %746 }
 0x444   : > { %v752_v33 = vsel %vm529_vm3, %v747_v32, 0  ;;  %v1073_v32 = vpack.c.bf16 %v1061_v31, %v1060_v30 }
 0x445   : > { %1279 = vmatpush3.bf16.msra.mxu0 %v752_v33  ;;  %v1062_v33 = vld [vmem:[%s1694_s9 + $0x40] sm:$0xff] }
 0x446   : > { %1290 = vmatprep.subr.bf16.mxu0 %v1384_v6 }
 0x448   : > { %1281 = vmatmul.mubr.msk.bf16.vlgmr.msra.gmra.mrb[16].mxu0 %vm465_vm2, %v745_v35  ;;  %v1074_v35 = vpack.c.bf16 %v1063_v34, %v1062_v33 }
 0x449   : > { %1291 = vmatpush3.bf16.msra.mxu0 %v862_v36  ;;  %1292 = vmatprep.mubr.msk.bf16.mxu0 %vm1385_vm1, %v1384_v6  ;;  %v1064_v36 = vld [vmem:[%s1694_s9 + $0x50] sm:$0xff] }
 0x44a   : > { %v1373_v37 = vpop.eup %1372  ;;  %1304 = vmatprep.subr.bf16.mxu0 %v1384_v6 }
 0x44b   : > { %v854_v38 = vmul.f32 %v1373_v37, %v1365_v14  ;;  %v1065_v37 = vld [vmem:[%s1694_s9 + $0x58] sm:$0xff] }
 0x44d   : > { %v855_v39 = vpack.c.bf16 %v854_v38, %v854_v38  ;;  %v1075_v38 = vpack.c.bf16 %v1065_v37, %v1064_v36 }
 0x450   : > { %1293 = vmatmul.mubr.msk.bf16.vlgmr.msra.gmra.mrb[20].mxu0 %vm465_vm2, %v855_v39 }
 0x451   : > { %1308 = vmatprep.mubr.msk.bf16.mxu0 %vm1385_vm1, %v1384_v6  ;;  %1305 = vmatpush3.bf16.msra.mxu0 %v1000_v18 }
 0x452   : > { %1306 = vmatprep.subr.bf16.mxu0 %v1384_v6 }
 0x4ee   : > { %v567_v40 = vpop.f32.mrb[8].mxu0 }
 0x4ef   : > { %v1258_v41 = vpop.f32.mrb[9].mxu0 }
 0x4f0   : > { %v570_v42 = vpop.f32.mrb[10].mxu0 }
 0x4f1   : > { %v1259_v43 = vpop.f32.mrb[11].mxu0 }
 0x4f2   : > { %v1200_v43 = vld [vmem:[%s1691_s6] ss:$0 sm:$0xff] }
 0x4f6   : > { %v678_v44 = vpop.f32.mrb[12].mxu0 }
 0x4f7   : > { %905 = vrot.lane.b32.xlu1 %v678_v44, %s1397_s30  ;;  %v1270_v45 = vpop.f32.mrb[13].mxu0 }
 0x4f8   : > { %v681_v46 = vpop.f32.mrb[14].mxu0 }
 0x4f9   : > { %v1271_v47 = vpop.f32.mrb[15].mxu0 }
 0x4fa   : > { %v1066_v47 = vld [vmem:[%s1694_s9 + $0x60] sm:$0xff] }
 0x4fb   : > { %v1076_v49 = vpack.c.bf16 %v1067_v48, %v1066_v47 }
 0x51b   : > { %v788_v54 = vpop.f32.mrb[16].mxu0 }
 0x51c   : > { %909 = vrot.lane.b32.xlu0 %v788_v54, %s1398_s23  ;;  %v1282_v55 = vpop.f32.mrb[17].mxu0 }
 0x51d   : > { %v791_v56 = vpop.f32.mrb[18].mxu0 }
 0x51e   : > { %v1283_v57 = vpop.f32.mrb[19].mxu0 }
 0x523   : > { %v898_v58 = vpop.f32.mrb[20].mxu0 }
 0x524   : > { %913 = vrot.lane.b32.xlu1 %v898_v58, %s1399_s24  ;;  %v1294_v59 = vpop.f32.mrb[21].mxu0 }
 0x525   : > { %v901_v60 = vpop.f32.mrb[22].mxu0 }
 0x526   : > { %v1295_v61 = vpop.f32.mrb[23].mxu0  ;;  %v1203_v60 = vld [vmem:[%s1695_s10] ss:$0 sm:$0xff] }
 0x569   : > { %v906_v62 = vpop.permute.xlu1 %905 }
 0x56a   : > { %v916_v1 = vsel %vm465_vm2, %v567_v40, %v906_v62 }
 0x58e   : > { %v910_v63 = vpop.permute.xlu0 %909 }
 0x58f   : > { %v918_v2 = vsel %vm917_vm4, %v916_v1, %v910_v63 }
 0x596   : > { %v914_v3 = vpop.permute.xlu1 %913 }
 0x597   : > { %v920_v4 = vsel %vm919_vm5, %v918_v2, %v914_v3 }
 0x598   : > { %v921_v5 = vpack.c.bf16 %v920_v4, %v920_v4 }
 0x59a   : > { %1301 = vmatmul.mubr.msk.bf16.vlgmr.msra.gmra.mrb[12].mxu1 %vm385_vm0, %v921_v5 }
 0x59b   : > { %1328 = vmatprep.mubr.msk.bf16.mxu1 %vm1385_vm1, %v1384_v6  ;;  %1313 = vmatpush3.bf16.msra.mxu1 %v1070_v25 }
 0x59c   : > { %1314 = vmatprep.subr.bf16.mxu1 %v1384_v6 }
 0x59f   : > { %1315 = vmatpush3.bf16.msra.mxu1 %v1071_v27 }
 0x5a0   : > { %1316 = vmatprep.subr.bf16.mxu1 %v1384_v6 }
 0x5a3   : > { %1317 = vmatpush3.bf16.msra.mxu1 %v1072_v29 }
 0x5a4   : > { %1318 = vmatprep.subr.bf16.mxu1 %v1384_v6 }
 0x5a7   : > { %1319 = vmatpush3.bf16.msra.mxu1 %v1073_v32 }
 0x5a8   : > { %1320 = vmatprep.subr.bf16.mxu1 %v1384_v6 }
 0x5ab   : > { %1321 = vmatpush3.bf16.msra.mxu1 %v1074_v35 }
 0x5ac   : > { %1322 = vmatprep.subr.bf16.mxu1 %v1384_v6 }
 0x5af   : > { %1323 = vmatpush3.bf16.msra.mxu1 %v1075_v38 }
 0x5b0   : > { %1324 = vmatprep.subr.bf16.mxu1 %v1384_v6 }
 0x5b3   : > { %1325 = vmatpush3.bf16.msra.mxu1 %v1076_v49 }
 0x5b4   : > { %1326 = vmatprep.subr.bf16.mxu1 %v1384_v6 }
 0x5b7   : > { %1327 = vmatpush3.bf16.msra.mxu1 %v1077_v52 }
 0x66d   : > { %v972_v8 = vpop.f32.mrb[12].mxu1 }
 0x66e   : > { %v973_v9 = vadd.f32 %v1198_v7, %v972_v8  ;;  %v1302_v10 = vpop.f32.mrb[13].mxu1 }
 0x66f   : > { %v975_v11 = vpop.f32.mrb[14].mxu1 }
 0x670   : > { %v1591_v12 = vadd.f32 %v973_v9, %v1476_v0  ;;  %v1303_v13 = vpop.f32.mrb[15].mxu1  ;;  %v998_v0 = vld [vmem:[%s1692_s7 + $0x10] sm:$0xff] }
 0x671   : > { %v1001_v20 = vpack.c.bf16 %v999_v19, %v998_v0 }
 0x672   : > { %v979_v14 = vmul.f32 %v1591_v12, %v1591_v12 }
 0x673   : > { %1307 = vmatpush3.bf16.msra.mxu0 %v1001_v20 }
 0x674   : > { %v980_v15 = vsel %vm385_vm0, %v979_v14, 0.0 }
 0x675   : > { %981 = vadd.xlane.f32.xlu0 %v980_v15 }
 0x702   : > { %v982_v39 = vpop.xlane.xlu0 %981 }
 0x703   : > { %v983_v40 = vmul.f32 0.03125, %v982_v39 }
 0x705   : > { %v984_v41 = vadd.f32 1.1920929e-07, %v983_v40 }
 0x707   : > { %1374 = vrsqrt.f32 %v984_v41 }
 0x711   : > { %v1375_v42 = vpop.eup %1374 }
 0x712   : > { %v986_v44 = vmul.f32 %v1375_v42, %v1591_v12 }
 0x714   : > { %v994_v45 = vmul.f32 %v1200_v43, %v986_v44 }
 0x716   : > { %v995_v46 = vpack.c.bf16 %v994_v45, %v994_v45 }
 0x718   : > { %1309 = vmatmul.mubr.msk.bf16.vlgmr.msra.gmra.mrb[24].mxu0 %vm385_vm0, %v995_v46 }
 0x7eb   : > { %v1046_v54 = vpop.f32.mrb[24].mxu0 }
 0x7ec   : > { %v1047_v55 = vadd.f32 %v1201_v53, %v1046_v54  ;;  %v1310_v56 = vpop.f32.mrb[25].mxu0 }
 0x7ed   : > { %v1049_v57 = vpop.f32.mrb[26].mxu0 }
 0x7ee   : > { %v1052_v6 = vmax.f32 %v1047_v55, 0.0  ;;  %v1311_v58 = vpop.f32.mrb[27].mxu0 }
 0x7f0   : > { %v1053_v59 = vpack.c.bf16 %v1052_v6, %v1052_v6 }
 0x7f2   : > { %1329 = vmatmul.mubr.bf16.vlgmr.msra.gmra.mrb[16].mxu1 %v1053_v59 }
 0x8c5   : > { %v1119_v61 = vpop.f32.mrb[16].mxu1 }
 0x8c6   : > { %v1120_v62 = vadd.f32 %v1203_v60, %v1119_v61  ;;  %v1330_v63 = vpop.f32.mrb[17].mxu1 }
 0x8c7   : > { %v1122_v1 = vpop.f32.mrb[18].mxu1 }
 0x8c8   : > { %v1125_v2 = vadd.f32 %v1120_v62, %v1591_v12  ;;  %v1331_v3 = vpop.f32.mrb[19].mxu1 }
 0x8ca   : > { %1126 = vst.msk [vmem:[%s381_s27] sm:$0xff] %vm385_vm0, %v1125_v2 }
 0x8cb PF: > { %s21_s17 = sadd.s32 1, %s1382_s17  }
 0x8cc   : > { %p18_p4 = scmp.ge.s32.totalorder %s21_s17, 4  }
 0x8ce   :  { %20 = sbr.rel (!%p18_p4) target bundleno = 1 (0x1), region = 94 }

</bundles_post_ra>
